<compile_context>
chip_gen: v7x
topology: tpu7x:2x2x1
jax: 0.10.0
libtpu: 0.0.40
codegen_flags: <defaults>
</compile_context>

<pallas_src>
import functools

import jax
import jax.numpy as jnp
import numpy as np
from jax.experimental import pallas as pl
from jax.experimental.pallas import tpu as pltpu

LN_EPS = 1e-5
_BF16 = jnp.bfloat16
_F32 = jnp.float32


def _layernorm(x, gamma, beta):
    # x: (rows, D), gamma/beta: (1, D); biased variance (PyTorch LayerNorm semantics), all f32
    mu = jnp.mean(x, axis=-1, keepdims=True)
    xc = x - mu
    var = jnp.mean(xc * xc, axis=-1, keepdims=True)
    inv = jax.lax.rsqrt(var + LN_EPS)
    return xc * inv * gamma + beta


def transformer_layer_kernel(mask_ref, x_ref,
                             wq_ref, bq_ref, wkv_ref, bkv_ref, wo_ref, bo_ref,
                             g1_ref, be1_ref, w1_ref, b1_ref, w2_ref, b2_ref,
                             g2_ref, be2_ref,
                             out_ref, kv_scratch, *, n_heads, tq):
    T = x_ref.shape[1]
    D = x_ref.shape[2]
    dh = D // n_heads
    qi = pl.program_id(1)

    # K/V for the whole sequence of this batch element, computed once per batch element
    # (full-width (T,D)@(D,2D) matmul). The x block has a constant index over the q-tile axis,
    # so its DMA is also elided for qi > 0.
    @pl.when(qi == 0)
    def _():
        x_full = x_ref[0].astype(_BF16)                                  # single bf16 cast of x
        kv = jnp.dot(x_full, wkv_ref[...], preferred_element_type=_F32) + bkv_ref[...]
        kv_scratch[...] = kv.astype(_BF16)                               # (T, 2D), head-major cols

    row0 = pl.multiple_of(qi * tq, tq)
    x_tile = x_ref[0, pl.ds(row0, tq), :]                                # (tq, D) f32 residual input
    xb = x_tile.astype(_BF16)
    mask_bias = mask_ref[0]                                              # (1, T): 0 valid, -1e9 pad

    # Q projection, full width. 1/sqrt(dh) is folded into wq/bq on the host.
    q = jnp.dot(xb, wq_ref[...], preferred_element_type=_F32) + bq_ref[...]   # (tq, D) f32
    qb = q.astype(_BF16)
    kv = kv_scratch[...]                                                 # (T, 2D) bf16

    # Per-head attention core (static unroll; head slices are static lane views — free when
    # dh is a multiple of 128 in production configs). Softmax stays f32; p cast to bf16 only
    # right before the P@V matmul. Rows whose keys are all padded get uniform attention
    # (exp(0)/T), matching the reference softmax — do not "fix".
    ctx_heads = []
    for h in range(n_heads):
        qh = qb[:, h * dh:(h + 1) * dh]                                  # (tq, dh)
        kh = kv[:, h * dh:(h + 1) * dh]                                  # (T, dh)
        vh = kv[:, D + h * dh:D + (h + 1) * dh]                          # (T, dh)
        s = jnp.einsum('qd,kd->qk', qh, kh, preferred_element_type=_F32) + mask_bias  # (tq, T)
        m = jnp.max(s, axis=-1, keepdims=True)
        p = jnp.exp(s - m)
        den = jnp.sum(p, axis=-1, keepdims=True)
        r = pl.reciprocal(den, approx=True)
        r = r * (2.0 - den * r)                 # one Newton-Raphson step -> near-exact 1/den
        p = (p * r).astype(_BF16)
        ctx_heads.append(jnp.dot(p, vh, preferred_element_type=_F32).astype(_BF16))

    # Head-concatenated context -> single full-K (tq,D)@(D,D) output projection on the MXU
    # (no (H,T,D) f32 temporary, no VPU head reduction).
    ctx = jnp.concatenate(ctx_heads, axis=-1)                            # (tq, D) bf16
    attn = jnp.dot(ctx, wo_ref[...], preferred_element_type=_F32) + bo_ref[...]

    # dropout == identity (eval); residual + LayerNorm (f32)
    h1 = _layernorm(x_tile + attn, g1_ref[...], be1_ref[...])

    # positionwise feed-forward (bf16 matmul operands, f32 accumulation)
    ff = jnp.dot(h1.astype(_BF16), w1_ref[...], preferred_element_type=_F32) + b1_ref[...]
    ff = jnp.maximum(ff, 0.0)
    ff = jnp.dot(ff.astype(_BF16), w2_ref[...], preferred_element_type=_F32) + b2_ref[...]
    h2 = _layernorm(ff + h1, g2_ref[...], be2_ref[...])

    out_ref[...] = h2[None].astype(out_ref.dtype)


def pack_params(params, *, n_heads):
    """One-time host-side packing (do this at model-load time, NOT per step):
    fuse K/V weights, fold the 1/sqrt(dh) scale into Q, and pre-cast matmul weights to bf16."""
    D = params["wq"].shape[0]
    dh = D // n_heads
    scale = 1.0 / float(np.sqrt(dh))
    return dict(
        wq=(params["wq"] * scale).astype(_BF16),
        bq=(params["bq"] * scale).astype(_F32),
        wkv=jnp.concatenate([params["wk"], params["wv"]], axis=1).astype(_BF16),   # (D, 2D)
        bkv=jnp.concatenate([params["bk"], params["bv"]], axis=1).astype(_F32),    # (1, 2D)
        wo=params["wo"].astype(_BF16),
        bo=params["bo"].astype(_F32),
        g1=params["g1"].astype(_F32), be1=params["be1"].astype(_F32),
        w1=params["w1"].astype(_BF16), b1=params["b1"].astype(_F32),
        w2=params["w2"].astype(_BF16), b2=params["b2"].astype(_F32),
        g2=params["g2"].astype(_F32), be2=params["be2"].astype(_F32),
    )


def _pick_q_tile(T):
    for cand in (256, 128, 64, 32, 16, 8):
        if T % cand == 0:
            return cand
    return T


def _vmem_capacity_bytes():
    try:
        return int(pltpu.get_tpu_info().vmem_capacity_bytes)
    except Exception:
        return 64 * 2 ** 20   # conservative floor (v7x per-core VMEM) if the query is unavailable


def transformer_layer(x, key_padding_mask, packed, *, n_heads):
    """x: [B, T, D] f32, key_padding_mask: [B, T] bool (True = pad), packed = pack_params(...)."""
    B, T, D = x.shape
    assert D % n_heads == 0
    d_ff = packed["w1"].shape[1]
    tq = _pick_q_tile(T)
    nq = T // tq

    mask_bias = jnp.where(key_padding_mask, -1e9, 0.0).astype(_F32).reshape(B, 1, T)

    operands = (mask_bias, x,
                packed["wq"], packed["bq"], packed["wkv"], packed["bkv"],
                packed["wo"], packed["bo"], packed["g1"], packed["be1"],
                packed["w1"], packed["b1"], packed["w2"], packed["b2"],
                packed["g2"], packed["be2"])

    kernel = functools.partial(transformer_layer_kernel, n_heads=n_heads, tq=tq)

    def run(single_buffer_weights):
        spec_kwargs = {}
        if single_buffer_weights:
            # Resident weights never change across grid steps (constant index maps), so single
            # buffering halves their VMEM footprint — most important under v7x's 64 MiB VMEM.
            spec_kwargs = dict(pipeline_mode=pl.Buffered(1))

        def full(shape):
            zero = (0,) * len(shape)
            return pl.BlockSpec(shape, lambda b, q, z=zero: z, **spec_kwargs)

        in_specs = [
            pl.BlockSpec((1, 1, T), lambda b, q: (b, 0, 0)),   # key-padding bias
            pl.BlockSpec((1, T, D), lambda b, q: (b, 0, 0)),   # x (full seq; reused across q tiles)
            full((D, D)), full((1, D)),                        # wq (scale folded), bq
            full((D, 2 * D)), full((1, 2 * D)),                # wkv, bkv
            full((D, D)), full((1, D)),                        # wo, bo
            full((1, D)), full((1, D)),                        # ln1 gamma, beta
            full((D, d_ff)), full((1, d_ff)),                  # w1, b1
            full((d_ff, D)), full((1, D)),                     # w2, b2
            full((1, D)), full((1, D)),                        # ln2 gamma, beta
        ]

        # VMEM budget: weights x buffering factor + double-buffered streamed blocks + KV scratch
        # + f32 temporaries, with margin; capped generation-aware (leave compiler headroom).
        wfac = 1 if single_buffer_weights else 2
        nbytes = lambda a: int(np.prod(a.shape)) * jnp.dtype(a.dtype).itemsize
        weight_bytes = sum(nbytes(o) for o in operands[2:])
        stream_bytes = 2 * ((T * D + T + tq * D) * 4)
        scratch_bytes = T * 2 * D * 2
        tmp_bytes = 4 * (T * 2 * D + 3 * tq * T + tq * d_ff + 8 * tq * D)
        needed = wfac * weight_bytes + stream_bytes + scratch_bytes + tmp_bytes
        cap = int(0.85 * _vmem_capacity_bytes())
        vmem_limit = min(max(32 * 2 ** 20, int(1.5 * needed)), cap)

        return pl.pallas_call(
            kernel,
            out_shape=jax.ShapeDtypeStruct((B, T, D), x.dtype),
            grid_spec=pltpu.PrefetchScalarGridSpec(
                num_scalar_prefetch=0,
                grid=(B, nq),
                in_specs=in_specs,
                out_specs=pl.BlockSpec((1, tq, D), lambda b, q: (b, q, 0)),
                scratch_shapes=[pltpu.VMEM((T, 2 * D), _BF16)],   # K/V cache for current batch elem
            ),
            compiler_params=pltpu.CompilerParams(
                dimension_semantics=("parallel", "arbitrary"),
                vmem_limit_bytes=vmem_limit,
            ),
        )(*operands)

    try:
        return run(True)
    except Exception:
        # pl.Buffered(1) not supported on this jax version -> fall back to default buffering.
        return run(False)


def reference_transformer_layer(x, key_padding_mask, params, *, n_heads):
    """Pure-JAX f32 reference mirroring the PyTorch forward (dropout = identity)."""
    B, T, D = x.shape
    dh = D // n_heads
    mask_bias = jnp.where(key_padding_mask, -1e9, 0.0)[:, None, None, :]  # (B,1,1,T)

    def ln(y, g, b):
        mu = jnp.mean(y, -1, keepdims=True)
        var = jnp.mean((y - mu) ** 2, -1, keepdims=True)
        return (y - mu) / jnp.sqrt(var + LN_EPS) * g + b

    q = x @ params["wq"] + params["bq"]
    k = x @ params["wk"] + params["bk"]
    v = x @ params["wv"] + params["bv"]
    q = q.reshape(B, T, n_heads, dh).transpose(0, 2, 1, 3) / jnp.sqrt(jnp.float32(dh))
    k = k.reshape(B, T, n_heads, dh).transpose(0, 2, 1, 3)
    v = v.reshape(B, T, n_heads, dh).transpose(0, 2, 1, 3)
    s = jnp.einsum("bhqd,bhkd->bhqk", q, k) + mask_bias
    p = jax.nn.softmax(s, axis=-1)
    a = jnp.einsum("bhqk,bhkd->bhqd", p, v).transpose(0, 2, 1, 3).reshape(B, T, D)
    a = a @ params["wo"] + params["bo"]
    h1 = ln(x + a, params["g1"], params["be1"])
    ff = jnp.maximum(h1 @ params["w1"] + params["b1"], 0.0)
    ff = ff @ params["w2"] + params["b2"]
    return ln(ff + h1, params["g2"], params["be2"])


def init_params(key, d_model, d_ff):
    ks = jax.random.split(key, 8)
    s = 0.05
    # weights are stored pre-transposed ([in, out]) so the math is x @ W + b
    return {
        "wq": s * jax.random.normal(ks[0], (d_model, d_model), jnp.float32),
        "wk": s * jax.random.normal(ks[1], (d_model, d_model), jnp.float32),
        "wv": s * jax.random.normal(ks[2], (d_model, d_model), jnp.float32),
        "bq": s * jax.random.normal(ks[3], (1, d_model), jnp.float32),
        "bk": jnp.zeros((1, d_model), jnp.float32),
        "bv": jnp.zeros((1, d_model), jnp.float32),
        "wo": s * jax.random.normal(ks[4], (d_model, d_model), jnp.float32),
        "bo": jnp.zeros((1, d_model), jnp.float32),
        "g1": jnp.ones((1, d_model), jnp.float32),
        "be1": jnp.zeros((1, d_model), jnp.float32),
        "w1": s * jax.random.normal(ks[5], (d_model, d_ff), jnp.float32),
        "b1": s * jax.random.normal(ks[6], (1, d_ff), jnp.float32),
        "w2": s * jax.random.normal(ks[7], (d_ff, d_model), jnp.float32),
        "b2": jnp.zeros((1, d_model), jnp.float32),
        "g2": jnp.ones((1, d_model), jnp.float32),
        "be2": jnp.zeros((1, d_model), jnp.float32),
    }


if __name__ == "__main__":
    # NOTE: toy shapes (D=32, dh=8) for the self-test; production configs should keep D, d_ff and
    # dh as multiples of 128 so head slices / stores are lane-dense.
    B, T, D, H, D_FF = 2, 8, 32, 4, 64
    key = jax.random.PRNGKey(0)
    kx, kp = jax.random.split(key)

    x = jax.random.normal(kx, (B, T, D), jnp.float32)
    # key_padding_mask: True = padded key (last two positions of batch 1 padded)
    key_padding_mask = jnp.zeros((B, T), jnp.bool_).at[1, -2:].set(True)
    params = init_params(kp, D, D_FF)
    packed = pack_params(params, n_heads=H)   # one-time weight packing (not per step)

    out = transformer_layer(x, key_padding_mask, packed, n_heads=H)
    out = jax.block_until_ready(out)

    ref = reference_transformer_layer(x, key_padding_mask, params, n_heads=H)
    # Matmul operands are bf16 (f32 accumulation), hence the loosened tolerance.
    np.testing.assert_allclose(np.asarray(out), np.asarray(ref), rtol=3e-2, atol=3e-2)

    print("KERNEL_OK")
</pallas_src>

<mosaic_0001>
module attributes {stable_mosaic.version = 11 : i64} {
  func.func @transformer_layer_kernel(%arg0: i32, %arg1: i32, %arg2: memref<1x1x8xf32, #tpu.memory_space<vmem>>, %arg3: memref<1x8x32xf32, #tpu.memory_space<vmem>>, %arg4: memref<32x32xbf16, #tpu.memory_space<vmem>>, %arg5: memref<1x32xf32, #tpu.memory_space<vmem>>, %arg6: memref<32x64xbf16, #tpu.memory_space<vmem>>, %arg7: memref<1x64xf32, #tpu.memory_space<vmem>>, %arg8: memref<32x32xbf16, #tpu.memory_space<vmem>>, %arg9: memref<1x32xf32, #tpu.memory_space<vmem>>, %arg10: memref<1x32xf32, #tpu.memory_space<vmem>>, %arg11: memref<1x32xf32, #tpu.memory_space<vmem>>, %arg12: memref<32x64xbf16, #tpu.memory_space<vmem>>, %arg13: memref<1x64xf32, #tpu.memory_space<vmem>>, %arg14: memref<64x32xbf16, #tpu.memory_space<vmem>>, %arg15: memref<1x32xf32, #tpu.memory_space<vmem>>, %arg16: memref<1x32xf32, #tpu.memory_space<vmem>>, %arg17: memref<1x32xf32, #tpu.memory_space<vmem>>, %arg18: memref<1x8x32xf32, #tpu.memory_space<vmem>>, %arg19: memref<8x64xbf16, #tpu.memory_space<vmem>>) attributes {dimension_semantics = [#tpu.dimension_semantics<parallel>, #tpu.dimension_semantics<arbitrary>], iteration_bounds = array<i64: 2, 1>, scalar_prefetch = 0 : i64, scratch_operands = 1 : i64, tpu.core_type = #tpu.core_type<tc>, window_params = [{transform_indices = @transform_0, window_bounds = array<i64: 1, 1, 8>}, {transform_indices = @transform_1, window_bounds = array<i64: 1, 8, 32>}, {pipeline_mode = #tpu.pipeline_mode<synchronous>, transform_indices = @transform_2, window_bounds = array<i64: 32, 32>}, {pipeline_mode = #tpu.pipeline_mode<synchronous>, transform_indices = @transform_3, window_bounds = array<i64: 1, 32>}, {pipeline_mode = #tpu.pipeline_mode<synchronous>, transform_indices = @transform_4, window_bounds = array<i64: 32, 64>}, {pipeline_mode = #tpu.pipeline_mode<synchronous>, transform_indices = @transform_5, window_bounds = array<i64: 1, 64>}, {pipeline_mode = #tpu.pipeline_mode<synchronous>, transform_indices = @transform_6, window_bounds = array<i64: 32, 32>}, {pipeline_mode = #tpu.pipeline_mode<synchronous>, transform_indices = @transform_7, window_bounds = array<i64: 1, 32>}, {pipeline_mode = #tpu.pipeline_mode<synchronous>, transform_indices = @transform_8, window_bounds = array<i64: 1, 32>}, {pipeline_mode = #tpu.pipeline_mode<synchronous>, transform_indices = @transform_9, window_bounds = array<i64: 1, 32>}, {pipeline_mode = #tpu.pipeline_mode<synchronous>, transform_indices = @transform_10, window_bounds = array<i64: 32, 64>}, {pipeline_mode = #tpu.pipeline_mode<synchronous>, transform_indices = @transform_11, window_bounds = array<i64: 1, 64>}, {pipeline_mode = #tpu.pipeline_mode<synchronous>, transform_indices = @transform_12, window_bounds = array<i64: 64, 32>}, {pipeline_mode = #tpu.pipeline_mode<synchronous>, transform_indices = @transform_13, window_bounds = array<i64: 1, 32>}, {pipeline_mode = #tpu.pipeline_mode<synchronous>, transform_indices = @transform_14, window_bounds = array<i64: 1, 32>}, {pipeline_mode = #tpu.pipeline_mode<synchronous>, transform_indices = @transform_15, window_bounds = array<i64: 1, 32>}, {transform_indices = @transform_16, window_bounds = array<i64: 1, 8, 32>}]} {
    %c0_i32 = arith.constant 0 : i32
    %0 = arith.cmpi eq, %arg1, %c0_i32 : i32
    %1 = arith.extui %0 : i1 to i32
    %c0_i32_0 = arith.constant 0 : i32
    %2 = arith.cmpi ne, %1, %c0_i32_0 : i32
    scf.if %2 {
      %c0_68 = arith.constant 0 : index
      %c0_69 = arith.constant 0 : index
      %c0_70 = arith.constant 0 : index
      %178 = vector.load %arg3[%c0_68, %c0_69, %c0_70] : memref<1x8x32xf32, #tpu.memory_space<vmem>>, vector<1x8x32xf32>
      %179 = vector.shape_cast %178 : vector<1x8x32xf32> to vector<8x32xf32>
      %180 = arith.truncf %179 : vector<8x32xf32> to vector<8x32xbf16>
      %c0_71 = arith.constant 0 : index
      %c0_72 = arith.constant 0 : index
      %181 = vector.load %arg6[%c0_71, %c0_72] : memref<32x64xbf16, #tpu.memory_space<vmem>>, vector<32x64xbf16>
      %cst_73 = arith.constant dense<0.000000e+00> : vector<8x64xf32>
      %182 = tpu.matmul %180, %181, %cst_73 {dimension_numbers = #tpu.dot_dimension_numbers<[1], [0], [0], [1], [0, 0, 1, 1], [], []>} : vector<8x32xbf16>, vector<32x64xbf16>, vector<8x64xf32> -> vector<8x64xf32>
      %c0_74 = arith.constant 0 : index
      %c0_75 = arith.constant 0 : index
      %183 = vector.load %arg7[%c0_74, %c0_75] : memref<1x64xf32, #tpu.memory_space<vmem>>, vector<1x64xf32>
      %184 = vector.broadcast %183 : vector<1x64xf32> to vector<8x64xf32>
      %185 = arith.addf %182, %184 : vector<8x64xf32>
      %186 = arith.truncf %185 : vector<8x64xf32> to vector<8x64xbf16>
      %c0_76 = arith.constant 0 : index
      %c0_77 = arith.constant 0 : index
      %187 = vector.load %arg19[%c0_76, %c0_77] : memref<8x64xbf16, #tpu.memory_space<vmem>>, vector<8x64xbf16>
      tpu.vector_store %arg19[%c0_76, %c0_77], %186 {strides = array<i32>} : memref<8x64xbf16, #tpu.memory_space<vmem>>, vector<8x64xbf16>,
    } else {
    }
    %c8_i32 = arith.constant 8 : i32
    %3 = arith.muli %arg1, %c8_i32 : i32
    %4 = tpu.assume_multiple %3, 8 : i32
    %c0 = arith.constant 0 : index
    %5 = arith.index_cast %4 : i32 to index
    %c0_1 = arith.constant 0 : index
    %6 = vector.load %arg3[%c0, %5, %c0_1] : memref<1x8x32xf32, #tpu.memory_space<vmem>>, vector<1x8x32xf32>
    %7 = vector.shape_cast %6 : vector<1x8x32xf32> to vector<8x32xf32>
    %8 = arith.truncf %7 : vector<8x32xf32> to vector<8x32xbf16>
    %c0_2 = arith.constant 0 : index
    %c0_3 = arith.constant 0 : index
    %c0_4 = arith.constant 0 : index
    %9 = vector.load %arg2[%c0_2, %c0_3, %c0_4] : memref<1x1x8xf32, #tpu.memory_space<vmem>>, vector<1x1x8xf32>
    %10 = vector.shape_cast %9 : vector<1x1x8xf32> to vector<1x8xf32>
    %c0_5 = arith.constant 0 : index
    %c0_6 = arith.constant 0 : index
    %11 = vector.load %arg4[%c0_5, %c0_6] : memref<32x32xbf16, #tpu.memory_space<vmem>>, vector<32x32xbf16>
    %cst = arith.constant dense<0.000000e+00> : vector<8x32xf32>
    %12 = tpu.matmul %8, %11, %cst {dimension_numbers = #tpu.dot_dimension_numbers<[1], [0], [0], [1], [0, 0, 1, 1], [], []>} : vector<8x32xbf16>, vector<32x32xbf16>, vector<8x32xf32> -> vector<8x32xf32>
    %c0_7 = arith.constant 0 : index
    %c0_8 = arith.constant 0 : index
    %13 = vector.load %arg5[%c0_7, %c0_8] : memref<1x32xf32, #tpu.memory_space<vmem>>, vector<1x32xf32>
    %14 = vector.broadcast %13 : vector<1x32xf32> to vector<8x32xf32>
    %15 = arith.addf %12, %14 : vector<8x32xf32>
    %16 = arith.truncf %15 : vector<8x32xf32> to vector<8x32xbf16>
    %c0_9 = arith.constant 0 : index
    %c0_10 = arith.constant 0 : index
    %17 = vector.load %arg19[%c0_9, %c0_10] : memref<8x64xbf16, #tpu.memory_space<vmem>>, vector<8x64xbf16>
    %18 = vector.extract_strided_slice %16 {offsets = [0, 0], sizes = [8, 8], strides = [1, 1]} : vector<8x32xbf16> to vector<8x8xbf16>
    %19 = vector.extract_strided_slice %17 {offsets = [0, 0], sizes = [8, 8], strides = [1, 1]} : vector<8x64xbf16> to vector<8x8xbf16>
    %20 = vector.extract_strided_slice %17 {offsets = [0, 32], sizes = [8, 8], strides = [1, 1]} : vector<8x64xbf16> to vector<8x8xbf16>
    "tpu.trace_start"() <{level = 10 : i32, message = "qd,kd->qk"}> : () -> ()
    %cst_11 = arith.constant dense<0.000000e+00> : vector<8x8xf32>
    %21 = tpu.matmul %18, %19, %cst_11 {dimension_numbers = #tpu.dot_dimension_numbers<[1], [1], [0], [0], [0, 0, 1, 0], [], []>} : vector<8x8xbf16>, vector<8x8xbf16>, vector<8x8xf32> -> vector<8x8xf32>
    "tpu.trace_stop"() : () -> ()
    %22 = vector.broadcast %10 : vector<1x8xf32> to vector<8x8xf32>
    %23 = arith.addf %21, %22 : vector<8x8xf32>
    %cst_12 = arith.constant dense<0xFF800000> : vector<8xf32>
    %24 = vector.multi_reduction <maximumf>, %23, %cst_12 [1] : vector<8x8xf32> to vector<8xf32>
    %25 = vector.shape_cast %24 : vector<8xf32> to vector<8x1xf32>
    %26 = vector.broadcast %25 : vector<8x1xf32> to vector<8x8xf32>
    %27 = arith.subf %23, %26 : vector<8x8xf32>
    %28 = math.exp %27 : vector<8x8xf32>
    %cst_13 = arith.constant dense<0.000000e+00> : vector<8xf32>
    %29 = vector.multi_reduction <add>, %28, %cst_13 [1] : vector<8x8xf32> to vector<8xf32>
    %30 = vector.shape_cast %29 : vector<8xf32> to vector<8x1xf32>
    %31 = tpu.reciprocal %30 {approx = true} : vector<8x1xf32> -> vector<8x1xf32>
    %32 = arith.mulf %30, %31 : vector<8x1xf32>
    %cst_14 = arith.constant 2.000000e+00 : f32
    %33 = vector.broadcast %cst_14 : f32 to vector<8x1xf32>
    %34 = arith.subf %33, %32 : vector<8x1xf32>
    %35 = arith.mulf %31, %34 : vector<8x1xf32>
    %36 = vector.broadcast %35 : vector<8x1xf32> to vector<8x8xf32>
    %37 = arith.mulf %28, %36 : vector<8x8xf32>
    %38 = arith.truncf %37 : vector<8x8xf32> to vector<8x8xbf16>
    %cst_15 = arith.constant dense<0.000000e+00> : vector<8x8xf32>
    %39 = tpu.matmul %38, %20, %cst_15 {dimension_numbers = #tpu.dot_dimension_numbers<[1], [0], [0], [1], [0, 0, 1, 1], [], []>} : vector<8x8xbf16>, vector<8x8xbf16>, vector<8x8xf32> -> vector<8x8xf32>
    %40 = arith.truncf %39 : vector<8x8xf32> to vector<8x8xbf16>
    %41 = vector.extract_strided_slice %16 {offsets = [0, 8], sizes = [8, 8], strides = [1, 1]} : vector<8x32xbf16> to vector<8x8xbf16>
    %42 = vector.extract_strided_slice %17 {offsets = [0, 8], sizes = [8, 8], strides = [1, 1]} : vector<8x64xbf16> to vector<8x8xbf16>
    %43 = vector.extract_strided_slice %17 {offsets = [0, 40], sizes = [8, 8], strides = [1, 1]} : vector<8x64xbf16> to vector<8x8xbf16>
    "tpu.trace_start"() <{level = 10 : i32, message = "qd,kd->qk"}> : () -> ()
    %cst_16 = arith.constant dense<0.000000e+00> : vector<8x8xf32>
    %44 = tpu.matmul %41, %42, %cst_16 {dimension_numbers = #tpu.dot_dimension_numbers<[1], [1], [0], [0], [0, 0, 1, 0], [], []>} : vector<8x8xbf16>, vector<8x8xbf16>, vector<8x8xf32> -> vector<8x8xf32>
    "tpu.trace_stop"() : () -> ()
    %45 = vector.broadcast %10 : vector<1x8xf32> to vector<8x8xf32>
    %46 = arith.addf %44, %45 : vector<8x8xf32>
    %cst_17 = arith.constant dense<0xFF800000> : vector<8xf32>
    %47 = vector.multi_reduction <maximumf>, %46, %cst_17 [1] : vector<8x8xf32> to vector<8xf32>
    %48 = vector.shape_cast %47 : vector<8xf32> to vector<8x1xf32>
    %49 = vector.broadcast %48 : vector<8x1xf32> to vector<8x8xf32>
    %50 = arith.subf %46, %49 : vector<8x8xf32>
    %51 = math.exp %50 : vector<8x8xf32>
    %cst_18 = arith.constant dense<0.000000e+00> : vector<8xf32>
    %52 = vector.multi_reduction <add>, %51, %cst_18 [1] : vector<8x8xf32> to vector<8xf32>
    %53 = vector.shape_cast %52 : vector<8xf32> to vector<8x1xf32>
    %54 = tpu.reciprocal %53 {approx = true} : vector<8x1xf32> -> vector<8x1xf32>
    %55 = arith.mulf %53, %54 : vector<8x1xf32>
    %cst_19 = arith.constant 2.000000e+00 : f32
    %56 = vector.broadcast %cst_19 : f32 to vector<8x1xf32>
    %57 = arith.subf %56, %55 : vector<8x1xf32>
    %58 = arith.mulf %54, %57 : vector<8x1xf32>
    %59 = vector.broadcast %58 : vector<8x1xf32> to vector<8x8xf32>
    %60 = arith.mulf %51, %59 : vector<8x8xf32>
    %61 = arith.truncf %60 : vector<8x8xf32> to vector<8x8xbf16>
    %cst_20 = arith.constant dense<0.000000e+00> : vector<8x8xf32>
    %62 = tpu.matmul %61, %43, %cst_20 {dimension_numbers = #tpu.dot_dimension_numbers<[1], [0], [0], [1], [0, 0, 1, 1], [], []>} : vector<8x8xbf16>, vector<8x8xbf16>, vector<8x8xf32> -> vector<8x8xf32>
    %63 = arith.truncf %62 : vector<8x8xf32> to vector<8x8xbf16>
    %64 = vector.extract_strided_slice %16 {offsets = [0, 16], sizes = [8, 8], strides = [1, 1]} : vector<8x32xbf16> to vector<8x8xbf16>
    %65 = vector.extract_strided_slice %17 {offsets = [0, 16], sizes = [8, 8], strides = [1, 1]} : vector<8x64xbf16> to vector<8x8xbf16>
    %66 = vector.extract_strided_slice %17 {offsets = [0, 48], sizes = [8, 8], strides = [1, 1]} : vector<8x64xbf16> to vector<8x8xbf16>
    "tpu.trace_start"() <{level = 10 : i32, message = "qd,kd->qk"}> : () -> ()
    %cst_21 = arith.constant dense<0.000000e+00> : vector<8x8xf32>
    %67 = tpu.matmul %64, %65, %cst_21 {dimension_numbers = #tpu.dot_dimension_numbers<[1], [1], [0], [0], [0, 0, 1, 0], [], []>} : vector<8x8xbf16>, vector<8x8xbf16>, vector<8x8xf32> -> vector<8x8xf32>
    "tpu.trace_stop"() : () -> ()
    %68 = vector.broadcast %10 : vector<1x8xf32> to vector<8x8xf32>
    %69 = arith.addf %67, %68 : vector<8x8xf32>
    %cst_22 = arith.constant dense<0xFF800000> : vector<8xf32>
    %70 = vector.multi_reduction <maximumf>, %69, %cst_22 [1] : vector<8x8xf32> to vector<8xf32>
    %71 = vector.shape_cast %70 : vector<8xf32> to vector<8x1xf32>
    %72 = vector.broadcast %71 : vector<8x1xf32> to vector<8x8xf32>
    %73 = arith.subf %69, %72 : vector<8x8xf32>
    %74 = math.exp %73 : vector<8x8xf32>
    %cst_23 = arith.constant dense<0.000000e+00> : vector<8xf32>
    %75 = vector.multi_reduction <add>, %74, %cst_23 [1] : vector<8x8xf32> to vector<8xf32>
    %76 = vector.shape_cast %75 : vector<8xf32> to vector<8x1xf32>
    %77 = tpu.reciprocal %76 {approx = true} : vector<8x1xf32> -> vector<8x1xf32>
    %78 = arith.mulf %76, %77 : vector<8x1xf32>
    %cst_24 = arith.constant 2.000000e+00 : f32
    %79 = vector.broadcast %cst_24 : f32 to vector<8x1xf32>
    %80 = arith.subf %79, %78 : vector<8x1xf32>
    %81 = arith.mulf %77, %80 : vector<8x1xf32>
    %82 = vector.broadcast %81 : vector<8x1xf32> to vector<8x8xf32>
    %83 = arith.mulf %74, %82 : vector<8x8xf32>
    %84 = arith.truncf %83 : vector<8x8xf32> to vector<8x8xbf16>
    %cst_25 = arith.constant dense<0.000000e+00> : vector<8x8xf32>
    %85 = tpu.matmul %84, %66, %cst_25 {dimension_numbers = #tpu.dot_dimension_numbers<[1], [0], [0], [1], [0, 0, 1, 1], [], []>} : vector<8x8xbf16>, vector<8x8xbf16>, vector<8x8xf32> -> vector<8x8xf32>
    %86 = arith.truncf %85 : vector<8x8xf32> to vector<8x8xbf16>
    %87 = vector.extract_strided_slice %16 {offsets = [0, 24], sizes = [8, 8], strides = [1, 1]} : vector<8x32xbf16> to vector<8x8xbf16>
    %88 = vector.extract_strided_slice %17 {offsets = [0, 24], sizes = [8, 8], strides = [1, 1]} : vector<8x64xbf16> to vector<8x8xbf16>
    %89 = vector.extract_strided_slice %17 {offsets = [0, 56], sizes = [8, 8], strides = [1, 1]} : vector<8x64xbf16> to vector<8x8xbf16>
    "tpu.trace_start"() <{level = 10 : i32, message = "qd,kd->qk"}> : () -> ()
    %cst_26 = arith.constant dense<0.000000e+00> : vector<8x8xf32>
    %90 = tpu.matmul %87, %88, %cst_26 {dimension_numbers = #tpu.dot_dimension_numbers<[1], [1], [0], [0], [0, 0, 1, 0], [], []>} : vector<8x8xbf16>, vector<8x8xbf16>, vector<8x8xf32> -> vector<8x8xf32>
    "tpu.trace_stop"() : () -> ()
    %91 = vector.broadcast %10 : vector<1x8xf32> to vector<8x8xf32>
    %92 = arith.addf %90, %91 : vector<8x8xf32>
    %cst_27 = arith.constant dense<0xFF800000> : vector<8xf32>
    %93 = vector.multi_reduction <maximumf>, %92, %cst_27 [1] : vector<8x8xf32> to vector<8xf32>
    %94 = vector.shape_cast %93 : vector<8xf32> to vector<8x1xf32>
    %95 = vector.broadcast %94 : vector<8x1xf32> to vector<8x8xf32>
    %96 = arith.subf %92, %95 : vector<8x8xf32>
    %97 = math.exp %96 : vector<8x8xf32>
    %cst_28 = arith.constant dense<0.000000e+00> : vector<8xf32>
    %98 = vector.multi_reduction <add>, %97, %cst_28 [1] : vector<8x8xf32> to vector<8xf32>
    %99 = vector.shape_cast %98 : vector<8xf32> to vector<8x1xf32>
    %100 = tpu.reciprocal %99 {approx = true} : vector<8x1xf32> -> vector<8x1xf32>
    %101 = arith.mulf %99, %100 : vector<8x1xf32>
    %cst_29 = arith.constant 2.000000e+00 : f32
    %102 = vector.broadcast %cst_29 : f32 to vector<8x1xf32>
    %103 = arith.subf %102, %101 : vector<8x1xf32>
    %104 = arith.mulf %100, %103 : vector<8x1xf32>
    %105 = vector.broadcast %104 : vector<8x1xf32> to vector<8x8xf32>
    %106 = arith.mulf %97, %105 : vector<8x8xf32>
    %107 = arith.truncf %106 : vector<8x8xf32> to vector<8x8xbf16>
    %cst_30 = arith.constant dense<0.000000e+00> : vector<8x8xf32>
    %108 = tpu.matmul %107, %89, %cst_30 {dimension_numbers = #tpu.dot_dimension_numbers<[1], [0], [0], [1], [0, 0, 1, 1], [], []>} : vector<8x8xbf16>, vector<8x8xbf16>, vector<8x8xf32> -> vector<8x8xf32>
    %109 = arith.truncf %108 : vector<8x8xf32> to vector<8x8xbf16>
    %110 = tpu.concatenate %40, %63, %86, %109 in 1 : vector<8x8xbf16>, vector<8x8xbf16>, vector<8x8xbf16>, vector<8x8xbf16> -> vector<8x32xbf16>
    %c0_31 = arith.constant 0 : index
    %c0_32 = arith.constant 0 : index
    %111 = vector.load %arg8[%c0_31, %c0_32] : memref<32x32xbf16, #tpu.memory_space<vmem>>, vector<32x32xbf16>
    %cst_33 = arith.constant dense<0.000000e+00> : vector<8x32xf32>
    %112 = tpu.matmul %110, %111, %cst_33 {dimension_numbers = #tpu.dot_dimension_numbers<[1], [0], [0], [1], [0, 0, 1, 1], [], []>} : vector<8x32xbf16>, vector<32x32xbf16>, vector<8x32xf32> -> vector<8x32xf32>
    %c0_34 = arith.constant 0 : index
    %c0_35 = arith.constant 0 : index
    %113 = vector.load %arg9[%c0_34, %c0_35] : memref<1x32xf32, #tpu.memory_space<vmem>>, vector<1x32xf32>
    %114 = vector.broadcast %113 : vector<1x32xf32> to vector<8x32xf32>
    %115 = arith.addf %112, %114 : vector<8x32xf32>
    %116 = arith.addf %7, %115 : vector<8x32xf32>
    %c0_36 = arith.constant 0 : index
    %c0_37 = arith.constant 0 : index
    %117 = vector.load %arg10[%c0_36, %c0_37] : memref<1x32xf32, #tpu.memory_space<vmem>>, vector<1x32xf32>
    %c0_38 = arith.constant 0 : index
    %c0_39 = arith.constant 0 : index
    %118 = vector.load %arg11[%c0_38, %c0_39] : memref<1x32xf32, #tpu.memory_space<vmem>>, vector<1x32xf32>
    %cst_40 = arith.constant dense<0.000000e+00> : vector<8xf32>
    %119 = vector.multi_reduction <add>, %116, %cst_40 [1] : vector<8x32xf32> to vector<8xf32>
    %120 = vector.shape_cast %119 : vector<8xf32> to vector<8x1xf32>
    %cst_41 = arith.constant 3.200000e+01 : f32
    %121 = vector.broadcast %cst_41 : f32 to vector<8x1xf32>
    %122 = arith.divf %120, %121 : vector<8x1xf32>
    %123 = vector.broadcast %122 : vector<8x1xf32> to vector<8x32xf32>
    %124 = arith.subf %116, %123 : vector<8x32xf32>
    %125 = arith.mulf %124, %124 : vector<8x32xf32>
    %cst_42 = arith.constant dense<0.000000e+00> : vector<8xf32>
    %126 = vector.multi_reduction <add>, %125, %cst_42 [1] : vector<8x32xf32> to vector<8xf32>
    %127 = vector.shape_cast %126 : vector<8xf32> to vector<8x1xf32>
    %cst_43 = arith.constant 3.200000e+01 : f32
    %128 = vector.broadcast %cst_43 : f32 to vector<8x1xf32>
    %129 = arith.divf %127, %128 : vector<8x1xf32>
    %cst_44 = arith.constant 9.99999974E-6 : f32
    %130 = vector.broadcast %cst_44 : f32 to vector<8x1xf32>
    %131 = arith.addf %129, %130 : vector<8x1xf32>
    %132 = math.rsqrt %131 : vector<8x1xf32>
    %133 = vector.broadcast %132 : vector<8x1xf32> to vector<8x32xf32>
    %134 = arith.mulf %124, %133 : vector<8x32xf32>
    %135 = vector.broadcast %117 : vector<1x32xf32> to vector<8x32xf32>
    %136 = arith.mulf %134, %135 : vector<8x32xf32>
    %137 = vector.broadcast %118 : vector<1x32xf32> to vector<8x32xf32>
    %138 = arith.addf %136, %137 : vector<8x32xf32>
    %139 = arith.truncf %138 : vector<8x32xf32> to vector<8x32xbf16>
    %c0_45 = arith.constant 0 : index
    %c0_46 = arith.constant 0 : index
    %140 = vector.load %arg12[%c0_45, %c0_46] : memref<32x64xbf16, #tpu.memory_space<vmem>>, vector<32x64xbf16>
    %cst_47 = arith.constant dense<0.000000e+00> : vector<8x64xf32>
    %141 = tpu.matmul %139, %140, %cst_47 {dimension_numbers = #tpu.dot_dimension_numbers<[1], [0], [0], [1], [0, 0, 1, 1], [], []>} : vector<8x32xbf16>, vector<32x64xbf16>, vector<8x64xf32> -> vector<8x64xf32>
    %c0_48 = arith.constant 0 : index
    %c0_49 = arith.constant 0 : index
    %142 = vector.load %arg13[%c0_48, %c0_49] : memref<1x64xf32, #tpu.memory_space<vmem>>, vector<1x64xf32>
    %143 = vector.broadcast %142 : vector<1x64xf32> to vector<8x64xf32>
    %144 = arith.addf %141, %143 : vector<8x64xf32>
    %cst_50 = arith.constant 0.000000e+00 : f32
    %145 = vector.broadcast %cst_50 : f32 to vector<8x64xf32>
    %146 = arith.maximumf %144, %145 : vector<8x64xf32>
    %147 = arith.truncf %146 : vector<8x64xf32> to vector<8x64xbf16>
    %c0_51 = arith.constant 0 : index
    %c0_52 = arith.constant 0 : index
    %148 = vector.load %arg14[%c0_51, %c0_52] : memref<64x32xbf16, #tpu.memory_space<vmem>>, vector<64x32xbf16>
    %cst_53 = arith.constant dense<0.000000e+00> : vector<8x32xf32>
    %149 = tpu.matmul %147, %148, %cst_53 {dimension_numbers = #tpu.dot_dimension_numbers<[1], [0], [0], [1], [0, 0, 1, 1], [], []>} : vector<8x64xbf16>, vector<64x32xbf16>, vector<8x32xf32> -> vector<8x32xf32>
    %c0_54 = arith.constant 0 : index
    %c0_55 = arith.constant 0 : index
    %150 = vector.load %arg15[%c0_54, %c0_55] : memref<1x32xf32, #tpu.memory_space<vmem>>, vector<1x32xf32>
    %151 = vector.broadcast %150 : vector<1x32xf32> to vector<8x32xf32>
    %152 = arith.addf %149, %151 : vector<8x32xf32>
    %153 = arith.addf %152, %138 : vector<8x32xf32>
    %c0_56 = arith.constant 0 : index
    %c0_57 = arith.constant 0 : index
    %154 = vector.load %arg16[%c0_56, %c0_57] : memref<1x32xf32, #tpu.memory_space<vmem>>, vector<1x32xf32>
    %c0_58 = arith.constant 0 : index
    %c0_59 = arith.constant 0 : index
    %155 = vector.load %arg17[%c0_58, %c0_59] : memref<1x32xf32, #tpu.memory_space<vmem>>, vector<1x32xf32>
    %cst_60 = arith.constant dense<0.000000e+00> : vector<8xf32>
    %156 = vector.multi_reduction <add>, %153, %cst_60 [1] : vector<8x32xf32> to vector<8xf32>
    %157 = vector.shape_cast %156 : vector<8xf32> to vector<8x1xf32>
    %cst_61 = arith.constant 3.200000e+01 : f32
    %158 = vector.broadcast %cst_61 : f32 to vector<8x1xf32>
    %159 = arith.divf %157, %158 : vector<8x1xf32>
    %160 = vector.broadcast %159 : vector<8x1xf32> to vector<8x32xf32>
    %161 = arith.subf %153, %160 : vector<8x32xf32>
    %162 = arith.mulf %161, %161 : vector<8x32xf32>
    %cst_62 = arith.constant dense<0.000000e+00> : vector<8xf32>
    %163 = vector.multi_reduction <add>, %162, %cst_62 [1] : vector<8x32xf32> to vector<8xf32>
    %164 = vector.shape_cast %163 : vector<8xf32> to vector<8x1xf32>
    %cst_63 = arith.constant 3.200000e+01 : f32
    %165 = vector.broadcast %cst_63 : f32 to vector<8x1xf32>
    %166 = arith.divf %164, %165 : vector<8x1xf32>
    %cst_64 = arith.constant 9.99999974E-6 : f32
    %167 = vector.broadcast %cst_64 : f32 to vector<8x1xf32>
    %168 = arith.addf %166, %167 : vector<8x1xf32>
    %169 = math.rsqrt %168 : vector<8x1xf32>
    %170 = vector.broadcast %169 : vector<8x1xf32> to vector<8x32xf32>
    %171 = arith.mulf %161, %170 : vector<8x32xf32>
    %172 = vector.broadcast %154 : vector<1x32xf32> to vector<8x32xf32>
    %173 = arith.mulf %171, %172 : vector<8x32xf32>
    %174 = vector.broadcast %155 : vector<1x32xf32> to vector<8x32xf32>
    %175 = arith.addf %173, %174 : vector<8x32xf32>
    %176 = vector.shape_cast %175 : vector<8x32xf32> to vector<1x8x32xf32>
    %c0_65 = arith.constant 0 : index
    %c0_66 = arith.constant 0 : index
    %c0_67 = arith.constant 0 : index
    %177 = vector.load %arg18[%c0_65, %c0_66, %c0_67] : memref<1x8x32xf32, #tpu.memory_space<vmem>>, vector<1x8x32xf32>
    tpu.vector_store %arg18[%c0_65, %c0_66, %c0_67], %176 {strides = array<i32>} : memref<1x8x32xf32, #tpu.memory_space<vmem>>, vector<1x8x32xf32>,
    return
  }
  func.func @transform_0(%arg0: i32, %arg1: i32) -> (i32, i32, i32) {
    %c0_i32 = arith.constant 0 : i32
    %c0_i32_0 = arith.constant 0 : i32
    %c0_i32_1 = arith.constant 0 : i32
    return %arg0, %c0_i32, %c0_i32_0 : i32, i32, i32
  }
  func.func @transform_1(%arg0: i32, %arg1: i32) -> (i32, i32, i32) {
    %c0_i32 = arith.constant 0 : i32
    %c0_i32_0 = arith.constant 0 : i32
    %c0_i32_1 = arith.constant 0 : i32
    return %arg0, %c0_i32, %c0_i32_0 : i32, i32, i32
  }
  func.func @transform_2(%arg0: i32, %arg1: i32) -> (i32, i32) {
    %c0_i32 = arith.constant 0 : i32
    %c0_i32_0 = arith.constant 0 : i32
    %c0_i32_1 = arith.constant 0 : i32
    return %c0_i32, %c0_i32_0 : i32, i32
  }
  func.func @transform_3(%arg0: i32, %arg1: i32) -> (i32, i32) {
    %c0_i32 = arith.constant 0 : i32
    %c0_i32_0 = arith.constant 0 : i32
    %c0_i32_1 = arith.constant 0 : i32
    return %c0_i32, %c0_i32_0 : i32, i32
  }
  func.func @transform_4(%arg0: i32, %arg1: i32) -> (i32, i32) {
    %c0_i32 = arith.constant 0 : i32
    %c0_i32_0 = arith.constant 0 : i32
    %c0_i32_1 = arith.constant 0 : i32
    return %c0_i32, %c0_i32_0 : i32, i32
  }
  func.func @transform_5(%arg0: i32, %arg1: i32) -> (i32, i32) {
    %c0_i32 = arith.constant 0 : i32
    %c0_i32_0 = arith.constant 0 : i32
    %c0_i32_1 = arith.constant 0 : i32
    return %c0_i32, %c0_i32_0 : i32, i32
  }
  func.func @transform_6(%arg0: i32, %arg1: i32) -> (i32, i32) {
    %c0_i32 = arith.constant 0 : i32
    %c0_i32_0 = arith.constant 0 : i32
    %c0_i32_1 = arith.constant 0 : i32
    return %c0_i32, %c0_i32_0 : i32, i32
  }
  func.func @transform_7(%arg0: i32, %arg1: i32) -> (i32, i32) {
    %c0_i32 = arith.constant 0 : i32
    %c0_i32_0 = arith.constant 0 : i32
    %c0_i32_1 = arith.constant 0 : i32
    return %c0_i32, %c0_i32_0 : i32, i32
  }
  func.func @transform_8(%arg0: i32, %arg1: i32) -> (i32, i32) {
    %c0_i32 = arith.constant 0 : i32
    %c0_i32_0 = arith.constant 0 : i32
    %c0_i32_1 = arith.constant 0 : i32
    return %c0_i32, %c0_i32_0 : i32, i32
  }
  func.func @transform_9(%arg0: i32, %arg1: i32) -> (i32, i32) {
    %c0_i32 = arith.constant 0 : i32
    %c0_i32_0 = arith.constant 0 : i32
    %c0_i32_1 = arith.constant 0 : i32
    return %c0_i32, %c0_i32_0 : i32, i32
  }
  func.func @transform_10(%arg0: i32, %arg1: i32) -> (i32, i32) {
    %c0_i32 = arith.constant 0 : i32
    %c0_i32_0 = arith.constant 0 : i32
    %c0_i32_1 = arith.constant 0 : i32
    return %c0_i32, %c0_i32_0 : i32, i32
  }
  func.func @transform_11(%arg0: i32, %arg1: i32) -> (i32, i32) {
    %c0_i32 = arith.constant 0 : i32
    %c0_i32_0 = arith.constant 0 : i32
    %c0_i32_1 = arith.constant 0 : i32
    return %c0_i32, %c0_i32_0 : i32, i32
  }
  func.func @transform_12(%arg0: i32, %arg1: i32) -> (i32, i32) {
    %c0_i32 = arith.constant 0 : i32
    %c0_i32_0 = arith.constant 0 : i32
    %c0_i32_1 = arith.constant 0 : i32
    return %c0_i32, %c0_i32_0 : i32, i32
  }
  func.func @transform_13(%arg0: i32, %arg1: i32) -> (i32, i32) {
    %c0_i32 = arith.constant 0 : i32
    %c0_i32_0 = arith.constant 0 : i32
    %c0_i32_1 = arith.constant 0 : i32
    return %c0_i32, %c0_i32_0 : i32, i32
  }
  func.func @transform_14(%arg0: i32, %arg1: i32) -> (i32, i32) {
    %c0_i32 = arith.constant 0 : i32
    %c0_i32_0 = arith.constant 0 : i32
    %c0_i32_1 = arith.constant 0 : i32
    return %c0_i32, %c0_i32_0 : i32, i32
  }
  func.func @transform_15(%arg0: i32, %arg1: i32) -> (i32, i32) {
    %c0_i32 = arith.constant 0 : i32
    %c0_i32_0 = arith.constant 0 : i32
    %c0_i32_1 = arith.constant 0 : i32
    return %c0_i32, %c0_i32_0 : i32, i32
  }
  func.func @transform_16(%arg0: i32, %arg1: i32) -> (i32, i32, i32) {
    %c0_i32 = arith.constant 0 : i32
    %c0_i32_0 = arith.constant 0 : i32
    return %arg0, %arg1, %c0_i32 : i32, i32, i32
  }
}

module attributes {stable_mosaic.version = 11 : i64} {
  func.func @transformer_layer_kernel(%arg0: i32, %arg1: i32, %arg2: memref<1x1x8xf32, #tpu.memory_space<vmem>>, %arg3: memref<1x8x32xf32, #tpu.memory_space<vmem>>, %arg4: memref<32x32xbf16, #tpu.memory_space<vmem>>, %arg5: memref<1x32xf32, #tpu.memory_space<vmem>>, %arg6: memref<32x64xbf16, #tpu.memory_space<vmem>>, %arg7: memref<1x64xf32, #tpu.memory_space<vmem>>, %arg8: memref<32x32xbf16, #tpu.memory_space<vmem>>, %arg9: memref<1x32xf32, #tpu.memory_space<vmem>>, %arg10: memref<1x32xf32, #tpu.memory_space<vmem>>, %arg11: memref<1x32xf32, #tpu.memory_space<vmem>>, %arg12: memref<32x64xbf16, #tpu.memory_space<vmem>>, %arg13: memref<1x64xf32, #tpu.memory_space<vmem>>, %arg14: memref<64x32xbf16, #tpu.memory_space<vmem>>, %arg15: memref<1x32xf32, #tpu.memory_space<vmem>>, %arg16: memref<1x32xf32, #tpu.memory_space<vmem>>, %arg17: memref<1x32xf32, #tpu.memory_space<vmem>>, %arg18: memref<1x8x32xf32, #tpu.memory_space<vmem>>, %arg19: memref<8x64xbf16, #tpu.memory_space<vmem>>) attributes {dimension_semantics = [#tpu.dimension_semantics<parallel>, #tpu.dimension_semantics<arbitrary>], iteration_bounds = array<i64: 2, 1>, scalar_prefetch = 0 : i64, scratch_operands = 1 : i64, tpu.core_type = #tpu.core_type<tc>, window_params = [{transform_indices = @transform_0, window_bounds = array<i64: 1, 1, 8>}, {transform_indices = @transform_1, window_bounds = array<i64: 1, 8, 32>}, {pipeline_mode = #tpu.pipeline_mode<synchronous>, transform_indices = @transform_2, window_bounds = array<i64: 32, 32>}, {pipeline_mode = #tpu.pipeline_mode<synchronous>, transform_indices = @transform_3, window_bounds = array<i64: 1, 32>}, {pipeline_mode = #tpu.pipeline_mode<synchronous>, transform_indices = @transform_4, window_bounds = array<i64: 32, 64>}, {pipeline_mode = #tpu.pipeline_mode<synchronous>, transform_indices = @transform_5, window_bounds = array<i64: 1, 64>}, {pipeline_mode = #tpu.pipeline_mode<synchronous>, transform_indices = @transform_6, window_bounds = array<i64: 32, 32>}, {pipeline_mode = #tpu.pipeline_mode<synchronous>, transform_indices = @transform_7, window_bounds = array<i64: 1, 32>}, {pipeline_mode = #tpu.pipeline_mode<synchronous>, transform_indices = @transform_8, window_bounds = array<i64: 1, 32>}, {pipeline_mode = #tpu.pipeline_mode<synchronous>, transform_indices = @transform_9, window_bounds = array<i64: 1, 32>}, {pipeline_mode = #tpu.pipeline_mode<synchronous>, transform_indices = @transform_10, window_bounds = array<i64: 32, 64>}, {pipeline_mode = #tpu.pipeline_mode<synchronous>, transform_indices = @transform_11, window_bounds = array<i64: 1, 64>}, {pipeline_mode = #tpu.pipeline_mode<synchronous>, transform_indices = @transform_12, window_bounds = array<i64: 64, 32>}, {pipeline_mode = #tpu.pipeline_mode<synchronous>, transform_indices = @transform_13, window_bounds = array<i64: 1, 32>}, {pipeline_mode = #tpu.pipeline_mode<synchronous>, transform_indices = @transform_14, window_bounds = array<i64: 1, 32>}, {pipeline_mode = #tpu.pipeline_mode<synchronous>, transform_indices = @transform_15, window_bounds = array<i64: 1, 32>}, {transform_indices = @transform_16, window_bounds = array<i64: 1, 8, 32>}]} {
    %c0_i32 = arith.constant 0 : i32
    %0 = arith.cmpi eq, %arg1, %c0_i32 : i32
    %1 = arith.extui %0 : i1 to i32
    %c0_i32_0 = arith.constant 0 : i32
    %2 = arith.cmpi ne, %1, %c0_i32_0 : i32
    scf.if %2 {
      %c0_68 = arith.constant 0 : index
      %c0_69 = arith.constant 0 : index
      %c0_70 = arith.constant 0 : index
      %178 = vector.load %arg3[%c0_68, %c0_69, %c0_70] : memref<1x8x32xf32, #tpu.memory_space<vmem>>, vector<1x8x32xf32>
      %179 = vector.shape_cast %178 : vector<1x8x32xf32> to vector<8x32xf32>
      %180 = arith.truncf %179 : vector<8x32xf32> to vector<8x32xbf16>
      %c0_71 = arith.constant 0 : index
      %c0_72 = arith.constant 0 : index
      %181 = vector.load %arg6[%c0_71, %c0_72] : memref<32x64xbf16, #tpu.memory_space<vmem>>, vector<32x64xbf16>
      %cst_73 = arith.constant dense<0.000000e+00> : vector<8x64xf32>
      %182 = tpu.matmul %180, %181, %cst_73 {dimension_numbers = #tpu.dot_dimension_numbers<[1], [0], [0], [1], [0, 0, 1, 1], [], []>} : vector<8x32xbf16>, vector<32x64xbf16>, vector<8x64xf32> -> vector<8x64xf32>
      %c0_74 = arith.constant 0 : index
      %c0_75 = arith.constant 0 : index
      %183 = vector.load %arg7[%c0_74, %c0_75] : memref<1x64xf32, #tpu.memory_space<vmem>>, vector<1x64xf32>
      %184 = vector.broadcast %183 : vector<1x64xf32> to vector<8x64xf32>
      %185 = arith.addf %182, %184 : vector<8x64xf32>
      %186 = arith.truncf %185 : vector<8x64xf32> to vector<8x64xbf16>
      %c0_76 = arith.constant 0 : index
      %c0_77 = arith.constant 0 : index
      %187 = vector.load %arg19[%c0_76, %c0_77] : memref<8x64xbf16, #tpu.memory_space<vmem>>, vector<8x64xbf16>
      tpu.vector_store %arg19[%c0_76, %c0_77], %186 {strides = array<i32>} : memref<8x64xbf16, #tpu.memory_space<vmem>>, vector<8x64xbf16>,
    } else {
    }
    %c8_i32 = arith.constant 8 : i32
    %3 = arith.muli %arg1, %c8_i32 : i32
    %4 = tpu.assume_multiple %3, 8 : i32
    %c0 = arith.constant 0 : index
    %5 = arith.index_cast %4 : i32 to index
    %c0_1 = arith.constant 0 : index
    %6 = vector.load %arg3[%c0, %5, %c0_1] : memref<1x8x32xf32, #tpu.memory_space<vmem>>, vector<1x8x32xf32>
    %7 = vector.shape_cast %6 : vector<1x8x32xf32> to vector<8x32xf32>
    %8 = arith.truncf %7 : vector<8x32xf32> to vector<8x32xbf16>
    %c0_2 = arith.constant 0 : index
    %c0_3 = arith.constant 0 : index
    %c0_4 = arith.constant 0 : index
    %9 = vector.load %arg2[%c0_2, %c0_3, %c0_4] : memref<1x1x8xf32, #tpu.memory_space<vmem>>, vector<1x1x8xf32>
    %10 = vector.shape_cast %9 : vector<1x1x8xf32> to vector<1x8xf32>
    %c0_5 = arith.constant 0 : index
    %c0_6 = arith.constant 0 : index
    %11 = vector.load %arg4[%c0_5, %c0_6] : memref<32x32xbf16, #tpu.memory_space<vmem>>, vector<32x32xbf16>
    %cst = arith.constant dense<0.000000e+00> : vector<8x32xf32>
    %12 = tpu.matmul %8, %11, %cst {dimension_numbers = #tpu.dot_dimension_numbers<[1], [0], [0], [1], [0, 0, 1, 1], [], []>} : vector<8x32xbf16>, vector<32x32xbf16>, vector<8x32xf32> -> vector<8x32xf32>
    %c0_7 = arith.constant 0 : index
    %c0_8 = arith.constant 0 : index
    %13 = vector.load %arg5[%c0_7, %c0_8] : memref<1x32xf32, #tpu.memory_space<vmem>>, vector<1x32xf32>
    %14 = vector.broadcast %13 : vector<1x32xf32> to vector<8x32xf32>
    %15 = arith.addf %12, %14 : vector<8x32xf32>
    %16 = arith.truncf %15 : vector<8x32xf32> to vector<8x32xbf16>
    %c0_9 = arith.constant 0 : index
    %c0_10 = arith.constant 0 : index
    %17 = vector.load %arg19[%c0_9, %c0_10] : memref<8x64xbf16, #tpu.memory_space<vmem>>, vector<8x64xbf16>
    %18 = vector.extract_strided_slice %16 {offsets = [0, 0], sizes = [8, 8], strides = [1, 1]} : vector<8x32xbf16> to vector<8x8xbf16>
    %19 = vector.extract_strided_slice %17 {offsets = [0, 0], sizes = [8, 8], strides = [1, 1]} : vector<8x64xbf16> to vector<8x8xbf16>
    %20 = vector.extract_strided_slice %17 {offsets = [0, 32], sizes = [8, 8], strides = [1, 1]} : vector<8x64xbf16> to vector<8x8xbf16>
    "tpu.trace_start"() <{level = 10 : i32, message = "qd,kd->qk"}> : () -> ()
    %cst_11 = arith.constant dense<0.000000e+00> : vector<8x8xf32>
    %21 = tpu.matmul %18, %19, %cst_11 {dimension_numbers = #tpu.dot_dimension_numbers<[1], [1], [0], [0], [0, 0, 1, 0], [], []>} : vector<8x8xbf16>, vector<8x8xbf16>, vector<8x8xf32> -> vector<8x8xf32>
    "tpu.trace_stop"() : () -> ()
    %22 = vector.broadcast %10 : vector<1x8xf32> to vector<8x8xf32>
    %23 = arith.addf %21, %22 : vector<8x8xf32>
    %cst_12 = arith.constant dense<0xFF800000> : vector<8xf32>
    %24 = vector.multi_reduction <maximumf>, %23, %cst_12 [1] : vector<8x8xf32> to vector<8xf32>
    %25 = vector.shape_cast %24 : vector<8xf32> to vector<8x1xf32>
    %26 = vector.broadcast %25 : vector<8x1xf32> to vector<8x8xf32>
    %27 = arith.subf %23, %26 : vector<8x8xf32>
    %28 = math.exp %27 : vector<8x8xf32>
    %cst_13 = arith.constant dense<0.000000e+00> : vector<8xf32>
    %29 = vector.multi_reduction <add>, %28, %cst_13 [1] : vector<8x8xf32> to vector<8xf32>
    %30 = vector.shape_cast %29 : vector<8xf32> to vector<8x1xf32>
    %31 = tpu.reciprocal %30 {approx = true} : vector<8x1xf32> -> vector<8x1xf32>
    %32 = arith.mulf %30, %31 : vector<8x1xf32>
    %cst_14 = arith.constant 2.000000e+00 : f32
    %33 = vector.broadcast %cst_14 : f32 to vector<8x1xf32>
    %34 = arith.subf %33, %32 : vector<8x1xf32>
    %35 = arith.mulf %31, %34 : vector<8x1xf32>
    %36 = vector.broadcast %35 : vector<8x1xf32> to vector<8x8xf32>
    %37 = arith.mulf %28, %36 : vector<8x8xf32>
    %38 = arith.truncf %37 : vector<8x8xf32> to vector<8x8xbf16>
    %cst_15 = arith.constant dense<0.000000e+00> : vector<8x8xf32>
    %39 = tpu.matmul %38, %20, %cst_15 {dimension_numbers = #tpu.dot_dimension_numbers<[1], [0], [0], [1], [0, 0, 1, 1], [], []>} : vector<8x8xbf16>, vector<8x8xbf16>, vector<8x8xf32> -> vector<8x8xf32>
    %40 = arith.truncf %39 : vector<8x8xf32> to vector<8x8xbf16>
    %41 = vector.extract_strided_slice %16 {offsets = [0, 8], sizes = [8, 8], strides = [1, 1]} : vector<8x32xbf16> to vector<8x8xbf16>
    %42 = vector.extract_strided_slice %17 {offsets = [0, 8], sizes = [8, 8], strides = [1, 1]} : vector<8x64xbf16> to vector<8x8xbf16>
    %43 = vector.extract_strided_slice %17 {offsets = [0, 40], sizes = [8, 8], strides = [1, 1]} : vector<8x64xbf16> to vector<8x8xbf16>
    "tpu.trace_start"() <{level = 10 : i32, message = "qd,kd->qk"}> : () -> ()
    %cst_16 = arith.constant dense<0.000000e+00> : vector<8x8xf32>
    %44 = tpu.matmul %41, %42, %cst_16 {dimension_numbers = #tpu.dot_dimension_numbers<[1], [1], [0], [0], [0, 0, 1, 0], [], []>} : vector<8x8xbf16>, vector<8x8xbf16>, vector<8x8xf32> -> vector<8x8xf32>
    "tpu.trace_stop"() : () -> ()
    %45 = vector.broadcast %10 : vector<1x8xf32> to vector<8x8xf32>
    %46 = arith.addf %44, %45 : vector<8x8xf32>
    %cst_17 = arith.constant dense<0xFF800000> : vector<8xf32>
    %47 = vector.multi_reduction <maximumf>, %46, %cst_17 [1] : vector<8x8xf32> to vector<8xf32>
    %48 = vector.shape_cast %47 : vector<8xf32> to vector<8x1xf32>
    %49 = vector.broadcast %48 : vector<8x1xf32> to vector<8x8xf32>
    %50 = arith.subf %46, %49 : vector<8x8xf32>
    %51 = math.exp %50 : vector<8x8xf32>
    %cst_18 = arith.constant dense<0.000000e+00> : vector<8xf32>
    %52 = vector.multi_reduction <add>, %51, %cst_18 [1] : vector<8x8xf32> to vector<8xf32>
    %53 = vector.shape_cast %52 : vector<8xf32> to vector<8x1xf32>
    %54 = tpu.reciprocal %53 {approx = true} : vector<8x1xf32> -> vector<8x1xf32>
    %55 = arith.mulf %53, %54 : vector<8x1xf32>
    %cst_19 = arith.constant 2.000000e+00 : f32
    %56 = vector.broadcast %cst_19 : f32 to vector<8x1xf32>
    %57 = arith.subf %56, %55 : vector<8x1xf32>
    %58 = arith.mulf %54, %57 : vector<8x1xf32>
    %59 = vector.broadcast %58 : vector<8x1xf32> to vector<8x8xf32>
    %60 = arith.mulf %51, %59 : vector<8x8xf32>
    %61 = arith.truncf %60 : vector<8x8xf32> to vector<8x8xbf16>
    %cst_20 = arith.constant dense<0.000000e+00> : vector<8x8xf32>
    %62 = tpu.matmul %61, %43, %cst_20 {dimension_numbers = #tpu.dot_dimension_numbers<[1], [0], [0], [1], [0, 0, 1, 1], [], []>} : vector<8x8xbf16>, vector<8x8xbf16>, vector<8x8xf32> -> vector<8x8xf32>
    %63 = arith.truncf %62 : vector<8x8xf32> to vector<8x8xbf16>
    %64 = vector.extract_strided_slice %16 {offsets = [0, 16], sizes = [8, 8], strides = [1, 1]} : vector<8x32xbf16> to vector<8x8xbf16>
    %65 = vector.extract_strided_slice %17 {offsets = [0, 16], sizes = [8, 8], strides = [1, 1]} : vector<8x64xbf16> to vector<8x8xbf16>
    %66 = vector.extract_strided_slice %17 {offsets = [0, 48], sizes = [8, 8], strides = [1, 1]} : vector<8x64xbf16> to vector<8x8xbf16>
    "tpu.trace_start"() <{level = 10 : i32, message = "qd,kd->qk"}> : () -> ()
    %cst_21 = arith.constant dense<0.000000e+00> : vector<8x8xf32>
    %67 = tpu.matmul %64, %65, %cst_21 {dimension_numbers = #tpu.dot_dimension_numbers<[1], [1], [0], [0], [0, 0, 1, 0], [], []>} : vector<8x8xbf16>, vector<8x8xbf16>, vector<8x8xf32> -> vector<8x8xf32>
    "tpu.trace_stop"() : () -> ()
    %68 = vector.broadcast %10 : vector<1x8xf32> to vector<8x8xf32>
    %69 = arith.addf %67, %68 : vector<8x8xf32>
    %cst_22 = arith.constant dense<0xFF800000> : vector<8xf32>
    %70 = vector.multi_reduction <maximumf>, %69, %cst_22 [1] : vector<8x8xf32> to vector<8xf32>
    %71 = vector.shape_cast %70 : vector<8xf32> to vector<8x1xf32>
    %72 = vector.broadcast %71 : vector<8x1xf32> to vector<8x8xf32>
    %73 = arith.subf %69, %72 : vector<8x8xf32>
    %74 = math.exp %73 : vector<8x8xf32>
    %cst_23 = arith.constant dense<0.000000e+00> : vector<8xf32>
    %75 = vector.multi_reduction <add>, %74, %cst_23 [1] : vector<8x8xf32> to vector<8xf32>
    %76 = vector.shape_cast %75 : vector<8xf32> to vector<8x1xf32>
    %77 = tpu.reciprocal %76 {approx = true} : vector<8x1xf32> -> vector<8x1xf32>
    %78 = arith.mulf %76, %77 : vector<8x1xf32>
    %cst_24 = arith.constant 2.000000e+00 : f32
    %79 = vector.broadcast %cst_24 : f32 to vector<8x1xf32>
    %80 = arith.subf %79, %78 : vector<8x1xf32>
    %81 = arith.mulf %77, %80 : vector<8x1xf32>
    %82 = vector.broadcast %81 : vector<8x1xf32> to vector<8x8xf32>
    %83 = arith.mulf %74, %82 : vector<8x8xf32>
    %84 = arith.truncf %83 : vector<8x8xf32> to vector<8x8xbf16>
    %cst_25 = arith.constant dense<0.000000e+00> : vector<8x8xf32>
    %85 = tpu.matmul %84, %66, %cst_25 {dimension_numbers = #tpu.dot_dimension_numbers<[1], [0], [0], [1], [0, 0, 1, 1], [], []>} : vector<8x8xbf16>, vector<8x8xbf16>, vector<8x8xf32> -> vector<8x8xf32>
    %86 = arith.truncf %85 : vector<8x8xf32> to vector<8x8xbf16>
    %87 = vector.extract_strided_slice %16 {offsets = [0, 24], sizes = [8, 8], strides = [1, 1]} : vector<8x32xbf16> to vector<8x8xbf16>
    %88 = vector.extract_strided_slice %17 {offsets = [0, 24], sizes = [8, 8], strides = [1, 1]} : vector<8x64xbf16> to vector<8x8xbf16>
    %89 = vector.extract_strided_slice %17 {offsets = [0, 56], sizes = [8, 8], strides = [1, 1]} : vector<8x64xbf16> to vector<8x8xbf16>
    "tpu.trace_start"() <{level = 10 : i32, message = "qd,kd->qk"}> : () -> ()
    %cst_26 = arith.constant dense<0.000000e+00> : vector<8x8xf32>
    %90 = tpu.matmul %87, %88, %cst_26 {dimension_numbers = #tpu.dot_dimension_numbers<[1], [1], [0], [0], [0, 0, 1, 0], [], []>} : vector<8x8xbf16>, vector<8x8xbf16>, vector<8x8xf32> -> vector<8x8xf32>
    "tpu.trace_stop"() : () -> ()
    %91 = vector.broadcast %10 : vector<1x8xf32> to vector<8x8xf32>
    %92 = arith.addf %90, %91 : vector<8x8xf32>
    %cst_27 = arith.constant dense<0xFF800000> : vector<8xf32>
    %93 = vector.multi_reduction <maximumf>, %92, %cst_27 [1] : vector<8x8xf32> to vector<8xf32>
    %94 = vector.shape_cast %93 : vector<8xf32> to vector<8x1xf32>
    %95 = vector.broadcast %94 : vector<8x1xf32> to vector<8x8xf32>
    %96 = arith.subf %92, %95 : vector<8x8xf32>
    %97 = math.exp %96 : vector<8x8xf32>
    %cst_28 = arith.constant dense<0.000000e+00> : vector<8xf32>
    %98 = vector.multi_reduction <add>, %97, %cst_28 [1] : vector<8x8xf32> to vector<8xf32>
    %99 = vector.shape_cast %98 : vector<8xf32> to vector<8x1xf32>
    %100 = tpu.reciprocal %99 {approx = true} : vector<8x1xf32> -> vector<8x1xf32>
    %101 = arith.mulf %99, %100 : vector<8x1xf32>
    %cst_29 = arith.constant 2.000000e+00 : f32
    %102 = vector.broadcast %cst_29 : f32 to vector<8x1xf32>
    %103 = arith.subf %102, %101 : vector<8x1xf32>
    %104 = arith.mulf %100, %103 : vector<8x1xf32>
    %105 = vector.broadcast %104 : vector<8x1xf32> to vector<8x8xf32>
    %106 = arith.mulf %97, %105 : vector<8x8xf32>
    %107 = arith.truncf %106 : vector<8x8xf32> to vector<8x8xbf16>
    %cst_30 = arith.constant dense<0.000000e+00> : vector<8x8xf32>
    %108 = tpu.matmul %107, %89, %cst_30 {dimension_numbers = #tpu.dot_dimension_numbers<[1], [0], [0], [1], [0, 0, 1, 1], [], []>} : vector<8x8xbf16>, vector<8x8xbf16>, vector<8x8xf32> -> vector<8x8xf32>
    %109 = arith.truncf %108 : vector<8x8xf32> to vector<8x8xbf16>
    %110 = tpu.concatenate %40, %63, %86, %109 in 1 : vector<8x8xbf16>, vector<8x8xbf16>, vector<8x8xbf16>, vector<8x8xbf16> -> vector<8x32xbf16>
    %c0_31 = arith.constant 0 : index
    %c0_32 = arith.constant 0 : index
    %111 = vector.load %arg8[%c0_31, %c0_32] : memref<32x32xbf16, #tpu.memory_space<vmem>>, vector<32x32xbf16>
    %cst_33 = arith.constant dense<0.000000e+00> : vector<8x32xf32>
    %112 = tpu.matmul %110, %111, %cst_33 {dimension_numbers = #tpu.dot_dimension_numbers<[1], [0], [0], [1], [0, 0, 1, 1], [], []>} : vector<8x32xbf16>, vector<32x32xbf16>, vector<8x32xf32> -> vector<8x32xf32>
    %c0_34 = arith.constant 0 : index
    %c0_35 = arith.constant 0 : index
    %113 = vector.load %arg9[%c0_34, %c0_35] : memref<1x32xf32, #tpu.memory_space<vmem>>, vector<1x32xf32>
    %114 = vector.broadcast %113 : vector<1x32xf32> to vector<8x32xf32>
    %115 = arith.addf %112, %114 : vector<8x32xf32>
    %116 = arith.addf %7, %115 : vector<8x32xf32>
    %c0_36 = arith.constant 0 : index
    %c0_37 = arith.constant 0 : index
    %117 = vector.load %arg10[%c0_36, %c0_37] : memref<1x32xf32, #tpu.memory_space<vmem>>, vector<1x32xf32>
    %c0_38 = arith.constant 0 : index
    %c0_39 = arith.constant 0 : index
    %118 = vector.load %arg11[%c0_38, %c0_39] : memref<1x32xf32, #tpu.memory_space<vmem>>, vector<1x32xf32>
    %cst_40 = arith.constant dense<0.000000e+00> : vector<8xf32>
    %119 = vector.multi_reduction <add>, %116, %cst_40 [1] : vector<8x32xf32> to vector<8xf32>
    %120 = vector.shape_cast %119 : vector<8xf32> to vector<8x1xf32>
    %cst_41 = arith.constant 3.200000e+01 : f32
    %121 = vector.broadcast %cst_41 : f32 to vector<8x1xf32>
    %122 = arith.divf %120, %121 : vector<8x1xf32>
    %123 = vector.broadcast %122 : vector<8x1xf32> to vector<8x32xf32>
    %124 = arith.subf %116, %123 : vector<8x32xf32>
    %125 = arith.mulf %124, %124 : vector<8x32xf32>
    %cst_42 = arith.constant dense<0.000000e+00> : vector<8xf32>
    %126 = vector.multi_reduction <add>, %125, %cst_42 [1] : vector<8x32xf32> to vector<8xf32>
    %127 = vector.shape_cast %126 : vector<8xf32> to vector<8x1xf32>
    %cst_43 = arith.constant 3.200000e+01 : f32
    %128 = vector.broadcast %cst_43 : f32 to vector<8x1xf32>
    %129 = arith.divf %127, %128 : vector<8x1xf32>
    %cst_44 = arith.constant 9.99999974E-6 : f32
    %130 = vector.broadcast %cst_44 : f32 to vector<8x1xf32>
    %131 = arith.addf %129, %130 : vector<8x1xf32>
    %132 = math.rsqrt %131 : vector<8x1xf32>
    %133 = vector.broadcast %132 : vector<8x1xf32> to vector<8x32xf32>
    %134 = arith.mulf %124, %133 : vector<8x32xf32>
    %135 = vector.broadcast %117 : vector<1x32xf32> to vector<8x32xf32>
    %136 = arith.mulf %134, %135 : vector<8x32xf32>
    %137 = vector.broadcast %118 : vector<1x32xf32> to vector<8x32xf32>
    %138 = arith.addf %136, %137 : vector<8x32xf32>
    %139 = arith.truncf %138 : vector<8x32xf32> to vector<8x32xbf16>
    %c0_45 = arith.constant 0 : index
    %c0_46 = arith.constant 0 : index
    %140 = vector.load %arg12[%c0_45, %c0_46] : memref<32x64xbf16, #tpu.memory_space<vmem>>, vector<32x64xbf16>
    %cst_47 = arith.constant dense<0.000000e+00> : vector<8x64xf32>
    %141 = tpu.matmul %139, %140, %cst_47 {dimension_numbers = #tpu.dot_dimension_numbers<[1], [0], [0], [1], [0, 0, 1, 1], [], []>} : vector<8x32xbf16>, vector<32x64xbf16>, vector<8x64xf32> -> vector<8x64xf32>
    %c0_48 = arith.constant 0 : index
    %c0_49 = arith.constant 0 : index
    %142 = vector.load %arg13[%c0_48, %c0_49] : memref<1x64xf32, #tpu.memory_space<vmem>>, vector<1x64xf32>
    %143 = vector.broadcast %142 : vector<1x64xf32> to vector<8x64xf32>
    %144 = arith.addf %141, %143 : vector<8x64xf32>
    %cst_50 = arith.constant 0.000000e+00 : f32
    %145 = vector.broadcast %cst_50 : f32 to vector<8x64xf32>
    %146 = arith.maximumf %144, %145 : vector<8x64xf32>
    %147 = arith.truncf %146 : vector<8x64xf32> to vector<8x64xbf16>
    %c0_51 = arith.constant 0 : index
    %c0_52 = arith.constant 0 : index
    %148 = vector.load %arg14[%c0_51, %c0_52] : memref<64x32xbf16, #tpu.memory_space<vmem>>, vector<64x32xbf16>
    %cst_53 = arith.constant dense<0.000000e+00> : vector<8x32xf32>
    %149 = tpu.matmul %147, %148, %cst_53 {dimension_numbers = #tpu.dot_dimension_numbers<[1], [0], [0], [1], [0, 0, 1, 1], [], []>} : vector<8x64xbf16>, vector<64x32xbf16>, vector<8x32xf32> -> vector<8x32xf32>
    %c0_54 = arith.constant 0 : index
    %c0_55 = arith.constant 0 : index
    %150 = vector.load %arg15[%c0_54, %c0_55] : memref<1x32xf32, #tpu.memory_space<vmem>>, vector<1x32xf32>
    %151 = vector.broadcast %150 : vector<1x32xf32> to vector<8x32xf32>
    %152 = arith.addf %149, %151 : vector<8x32xf32>
    %153 = arith.addf %152, %138 : vector<8x32xf32>
    %c0_56 = arith.constant 0 : index
    %c0_57 = arith.constant 0 : index
    %154 = vector.load %arg16[%c0_56, %c0_57] : memref<1x32xf32, #tpu.memory_space<vmem>>, vector<1x32xf32>
    %c0_58 = arith.constant 0 : index
    %c0_59 = arith.constant 0 : index
    %155 = vector.load %arg17[%c0_58, %c0_59] : memref<1x32xf32, #tpu.memory_space<vmem>>, vector<1x32xf32>
    %cst_60 = arith.constant dense<0.000000e+00> : vector<8xf32>
    %156 = vector.multi_reduction <add>, %153, %cst_60 [1] : vector<8x32xf32> to vector<8xf32>
    %157 = vector.shape_cast %156 : vector<8xf32> to vector<8x1xf32>
    %cst_61 = arith.constant 3.200000e+01 : f32
    %158 = vector.broadcast %cst_61 : f32 to vector<8x1xf32>
    %159 = arith.divf %157, %158 : vector<8x1xf32>
    %160 = vector.broadcast %159 : vector<8x1xf32> to vector<8x32xf32>
    %161 = arith.subf %153, %160 : vector<8x32xf32>
    %162 = arith.mulf %161, %161 : vector<8x32xf32>
    %cst_62 = arith.constant dense<0.000000e+00> : vector<8xf32>
    %163 = vector.multi_reduction <add>, %162, %cst_62 [1] : vector<8x32xf32> to vector<8xf32>
    %164 = vector.shape_cast %163 : vector<8xf32> to vector<8x1xf32>
    %cst_63 = arith.constant 3.200000e+01 : f32
    %165 = vector.broadcast %cst_63 : f32 to vector<8x1xf32>
    %166 = arith.divf %164, %165 : vector<8x1xf32>
    %cst_64 = arith.constant 9.99999974E-6 : f32
    %167 = vector.broadcast %cst_64 : f32 to vector<8x1xf32>
    %168 = arith.addf %166, %167 : vector<8x1xf32>
    %169 = math.rsqrt %168 : vector<8x1xf32>
    %170 = vector.broadcast %169 : vector<8x1xf32> to vector<8x32xf32>
    %171 = arith.mulf %161, %170 : vector<8x32xf32>
    %172 = vector.broadcast %154 : vector<1x32xf32> to vector<8x32xf32>
    %173 = arith.mulf %171, %172 : vector<8x32xf32>
    %174 = vector.broadcast %155 : vector<1x32xf32> to vector<8x32xf32>
    %175 = arith.addf %173, %174 : vector<8x32xf32>
    %176 = vector.shape_cast %175 : vector<8x32xf32> to vector<1x8x32xf32>
    %c0_65 = arith.constant 0 : index
    %c0_66 = arith.constant 0 : index
    %c0_67 = arith.constant 0 : index
    %177 = vector.load %arg18[%c0_65, %c0_66, %c0_67] : memref<1x8x32xf32, #tpu.memory_space<vmem>>, vector<1x8x32xf32>
    tpu.vector_store %arg18[%c0_65, %c0_66, %c0_67], %176 {strides = array<i32>} : memref<1x8x32xf32, #tpu.memory_space<vmem>>, vector<1x8x32xf32>,
    return
  }
  func.func @transform_0(%arg0: i32, %arg1: i32) -> (i32, i32, i32) {
    %c0_i32 = arith.constant 0 : i32
    %c0_i32_0 = arith.constant 0 : i32
    %c0_i32_1 = arith.constant 0 : i32
    return %arg0, %c0_i32, %c0_i32_0 : i32, i32, i32
  }
  func.func @transform_1(%arg0: i32, %arg1: i32) -> (i32, i32, i32) {
    %c0_i32 = arith.constant 0 : i32
    %c0_i32_0 = arith.constant 0 : i32
    %c0_i32_1 = arith.constant 0 : i32
    return %arg0, %c0_i32, %c0_i32_0 : i32, i32, i32
  }
  func.func @transform_2(%arg0: i32, %arg1: i32) -> (i32, i32) {
    %c0_i32 = arith.constant 0 : i32
    %c0_i32_0 = arith.constant 0 : i32
    %c0_i32_1 = arith.constant 0 : i32
    return %c0_i32, %c0_i32_0 : i32, i32
  }
  func.func @transform_3(%arg0: i32, %arg1: i32) -> (i32, i32) {
    %c0_i32 = arith.constant 0 : i32
    %c0_i32_0 = arith.constant 0 : i32
    %c0_i32_1 = arith.constant 0 : i32
    return %c0_i32, %c0_i32_0 : i32, i32
  }
  func.func @transform_4(%arg0: i32, %arg1: i32) -> (i32, i32) {
    %c0_i32 = arith.constant 0 : i32
    %c0_i32_0 = arith.constant 0 : i32
    %c0_i32_1 = arith.constant 0 : i32
    return %c0_i32, %c0_i32_0 : i32, i32
  }
  func.func @transform_5(%arg0: i32, %arg1: i32) -> (i32, i32) {
    %c0_i32 = arith.constant 0 : i32
    %c0_i32_0 = arith.constant 0 : i32
    %c0_i32_1 = arith.constant 0 : i32
    return %c0_i32, %c0_i32_0 : i32, i32
  }
  func.func @transform_6(%arg0: i32, %arg1: i32) -> (i32, i32) {
    %c0_i32 = arith.constant 0 : i32
    %c0_i32_0 = arith.constant 0 : i32
    %c0_i32_1 = arith.constant 0 : i32
    return %c0_i32, %c0_i32_0 : i32, i32
  }
  func.func @transform_7(%arg0: i32, %arg1: i32) -> (i32, i32) {
    %c0_i32 = arith.constant 0 : i32
    %c0_i32_0 = arith.constant 0 : i32
    %c0_i32_1 = arith.constant 0 : i32
    return %c0_i32, %c0_i32_0 : i32, i32
  }
  func.func @transform_8(%arg0: i32, %arg1: i32) -> (i32, i32) {
    %c0_i32 = arith.constant 0 : i32
    %c0_i32_0 = arith.constant 0 : i32
    %c0_i32_1 = arith.constant 0 : i32
    return %c0_i32, %c0_i32_0 : i32, i32
  }
  func.func @transform_9(%arg0: i32, %arg1: i32) -> (i32, i32) {
    %c0_i32 = arith.constant 0 : i32
    %c0_i32_0 = arith.constant 0 : i32
    %c0_i32_1 = arith.constant 0 : i32
    return %c0_i32, %c0_i32_0 : i32, i32
  }
  func.func @transform_10(%arg0: i32, %arg1: i32) -> (i32, i32) {
    %c0_i32 = arith.constant 0 : i32
    %c0_i32_0 = arith.constant 0 : i32
    %c0_i32_1 = arith.constant 0 : i32
    return %c0_i32, %c0_i32_0 : i32, i32
  }
  func.func @transform_11(%arg0: i32, %arg1: i32) -> (i32, i32) {
    %c0_i32 = arith.constant 0 : i32
    %c0_i32_0 = arith.constant 0 : i32
    %c0_i32_1 = arith.constant 0 : i32
    return %c0_i32, %c0_i32_0 : i32, i32
  }
  func.func @transform_12(%arg0: i32, %arg1: i32) -> (i32, i32) {
    %c0_i32 = arith.constant 0 : i32
    %c0_i32_0 = arith.constant 0 : i32
    %c0_i32_1 = arith.constant 0 : i32
    return %c0_i32, %c0_i32_0 : i32, i32
  }
  func.func @transform_13(%arg0: i32, %arg1: i32) -> (i32, i32) {
    %c0_i32 = arith.constant 0 : i32
    %c0_i32_0 = arith.constant 0 : i32
    %c0_i32_1 = arith.constant 0 : i32
    return %c0_i32, %c0_i32_0 : i32, i32
  }
  func.func @transform_14(%arg0: i32, %arg1: i32) -> (i32, i32) {
    %c0_i32 = arith.constant 0 : i32
    %c0_i32_0 = arith.constant 0 : i32
    %c0_i32_1 = arith.constant 0 : i32
    return %c0_i32, %c0_i32_0 : i32, i32
  }
  func.func @transform_15(%arg0: i32, %arg1: i32) -> (i32, i32) {
    %c0_i32 = arith.constant 0 : i32
    %c0_i32_0 = arith.constant 0 : i32
    %c0_i32_1 = arith.constant 0 : i32
    return %c0_i32, %c0_i32_0 : i32, i32
  }
  func.func @transform_16(%arg0: i32, %arg1: i32) -> (i32, i32, i32) {
    %c0_i32 = arith.constant 0 : i32
    %c0_i32_0 = arith.constant 0 : i32
    return %arg0, %arg1, %c0_i32 : i32, i32, i32
  }
}

</mosaic_0001>

<bundles_post_ra>
// kernel: tpu_custom_call.1
= control target key start
LH: loop header
LB: loop body
LE: loop exit
PB: predicated region body
PF: predicated region fallthrough
CT: control target
= control target key end

     0   :  { %s2788_s0 = inlined_call_operand.hbm [shape: f32[2,1,8], index: 0, kind: input, shape index: {}]   ;;  %s2789_s1 = inlined_call_operand.vmem [shape: f32[2,8,32], index: 1, kind: input, shape index: {}]   ;;  %s2790_s2 = inlined_call_operand.vmem [shape: bf16[32,32], index: 2, kind: input, shape index: {}]   ;;  %s2791_s3 = inlined_call_operand.vmem [shape: f32[1,32], index: 3, kind: input, shape index: {}]   ;;  %s2792_s4 = inlined_call_operand.vmem [shape: bf16[32,64], index: 4, kind: input, shape index: {}]   ;;  %s2793_s5 = inlined_call_operand.vmem [shape: f32[1,64], index: 5, kind: input, shape index: {}]   ;;  %s2794_s6 = inlined_call_operand.hbm [shape: bf16[32,32], index: 6, kind: input, shape index: {}]   ;;  %s2795_s7 = inlined_call_operand.hbm [shape: f32[1,32], index: 7, kind: input, shape index: {}]   ;;  %s2796_s8 = inlined_call_operand.hbm [shape: f32[1,32], index: 8, kind: input, shape index: {}]   ;;  %s2797_s9 = inlined_call_operand.hbm [shape: f32[1,32], index: 9, kind: input, shape index: {}]   ;;  %s2798_s10 = inlined_call_operand.vmem [shape: bf16[32,64], index: 10, kind: input, shape index: {}]   ;;  %s2799_s11 = inlined_call_operand.vmem [shape: f32[1,64], index: 11, kind: input, shape index: {}]   ;;  %s2800_s12 = inlined_call_operand.vmem [shape: bf16[64,32], index: 12, kind: input, shape index: {}]   ;;  %s2801_s13 = inlined_call_operand.vmem [shape: f32[1,32], index: 13, kind: input, shape index: {}]   ;;  %s2802_s14 = inlined_call_operand.vmem [shape: f32[1,32], index: 14, kind: input, shape index: {}]   ;;  %s2803_s15 = inlined_call_operand.vmem [shape: f32[1,32], index: 15, kind: input, shape index: {}]   ;;  %s2804_s16 = inlined_call_operand.hbm [shape: f32[2,8,32], index: 16, kind: output, shape index: {}]  }
   0x1   :  { %2814 = sst [smem:[#allocation17_spill]] %s2788_s0 }
   0x2   :  { %2815 = sst [smem:[#allocation18_spill]] %s2789_s1 }
   0x3   :  { %2816 = sst [smem:[#allocation19_spill]] %s2790_s2 }
   0x4   :  { %2817 = sst [smem:[#allocation20_spill]] %s2791_s3 }
   0x5   :  { %2818 = sst [smem:[#allocation21_spill]] %s2792_s4 }
   0x6   :  { %2819 = sst [smem:[#allocation22_spill]] %s2793_s5 }
   0x7   :  { %2820 = sst [smem:[#allocation23_spill]] %s2794_s6 }
   0x8   :  { %2821 = sst [smem:[#allocation24_spill]] %s2798_s10 }
   0x9   :  { %2822 = sst [smem:[#allocation25_spill]] %s2799_s11 }
   0xa   :  { %2823 = sst [smem:[#allocation26_spill]] %s2800_s12 }
   0xb   :  { %2824 = sst [smem:[#allocation27_spill]] %s2801_s13 }
   0xc   :  { %2825 = sst [smem:[#allocation28_spill]] %s2802_s14 }
   0xd   :  { %2826 = sst [smem:[#allocation29_spill]] %s2803_s15 }
   0xe   :  { %2827 = sst [smem:[#allocation30_spill]] %s2804_s16 }
   0xf   :  { %21 = vsyncpa [#allocation4], 0 }
  0x10   :  { %23 = vsyncpa [#allocation4 + $0x1], 0 }
  0x11   :  { %24 = vsyncpa [#allocation7], 0 }
  0x12   :  { %25 = vsyncpa [#allocation10], 0 }
  0x13   :  { %26 = vsyncpa [#allocation5], 0 }
  0x14   :  { %28 = vsyncpa [#allocation5 + $0x1], 0  ;;  %s2342_s21 = smov 0   ;;  %s2344_s22 = smov 0  }
  0x15   :  { %s2346_s23 = smov 0   ;;  %s2348_s24 = smov 0  }
  0x16   :  { %s2350_s25 = smov 0   ;;  %s2352_s26 = smov 0  }
  0x17 LB: > { %s2806_s27 = sadd.s32 4294967295, %s2235_s26   ;;  %p1674_p0 = scmp.ge.s32.totalorder %s2235_s26, 1  ;;  %s2235_s26 = sphi %s2352_s26, %s34_s26   ;;  %s2231_s25 = sphi %s2350_s25, %s2862_s25   ;;  %s2227_s24 = sphi %s2348_s24, %s2861_s24   ;;  %s2223_s23 = sphi %s2346_s23, %s2860_s23   ;;  %s2219_s22 = sphi %s2344_s22, %s2859_s22   ;;  %s2215_s21 = sphi %s2342_s21, %s2858_s21  }
  0x18   : > { %p2376_p1 = scmp.eq.s32.totalorder %s2806_s27, 0  ;;  %p425_p2 = scmp.lt.s32.totalorder %s2235_s26, 3 }
  0x19   : > { %s2237_s30 = smov [#allocation6]   ;;  %s2238_s18 = smov [#allocation9]  }
  0x1a   : > { %s2828_s28 = scalar_select %p2376_p1, 1, 0 }
  0x1b   : > { %p2381_p3 = pnand %p1674_p0, %p425_p2  ;;  %s449_s0 = sshll.u32 %s2237_s30, 4  ;;  %s2385_s0 = int_to_ptr.vmem [resolvable:$true] %s449_s0 }
  0x1c   : > { %s474_s19 = sshll.u32 %s2238_s18, 4  ;;  %s2239_s20 = smov [#allocation8]   ;;  %s2396_s19 = int_to_ptr.vmem [resolvable:$true] %s474_s19 }
  0x1d   : > { %s2829_s29 = scalar_select %p2381_p3, 1, 0 }
  0x1e   : > { %p1873_p4 = pneg %p2381_p3  ;;  %s2398_s27 = sshll.u32 %s2239_s20, 4  ;;  %s464_s27 = int_to_ptr.vmem [resolvable:$true] %s2398_s27 }
  0x1f   : > { %s2831_s6 = sld [smem:[#allocation23_spill]] }
  0x20   : > { %p2392_p6 = pnand %p1873_p4, %p2376_p1 }
  0x22   : > { %p2408_p8 = pneg %p2392_p6 }
  0x25   : > { %s2003_s15 = scalar_lea.hbm %s2831_s6, 256 }
  0x26   : > { %p2004_p7 = scmp.ne.s32.totalorder %s2831_s6, %s2003_s15  ;;  %p2010_p11 = scmp.lt.u32.totalorder %s2003_s15, %s2831_s6 }
  0x28   : > { %p2006_p9 = pnand %p2408_p8, %p2004_p7 }
  0x2a   : > { %p2007_p10 = pneg %p2006_p9 }
  0x2c   : > { %p2012_p12 = pnand %p2010_p11, %p2007_p10 }
  0x2e   : > { %2015 = shalt.err (!%p2012_p12)
}
  0x2f   : > { %s2016_s13 = scalar_lea.vmem %s2385_s0, 256  ;;  %p2024_p4 = scmp.lt.s32.totalorder %s2385_s0, %s2385_s0 }
  0x30   : > { %p2017_p13 = scmp.ne.s32.totalorder %s2385_s0, %s2016_s13  ;;  %p2025_p5 = scmp.lt.s32.totalorder %s2016_s13, %s2016_s13 }
  0x32   : > { %p2019_p0 = pnand %p2017_p13, %p2408_p8  ;;  %p2026_p7 = por %p2025_p5, %p2024_p4 }
  0x34   : > { %p2020_p2 = pneg %p2019_p0 }
  0x36   : > { %p2027_p9 = pnand %p2026_p7, %p2020_p2 }
  0x38   : > { %2030 = shalt.err (!%p2027_p9)
}
  0x39   : > { %s2240_s14 = smov 64   ;;  %s2241_s15 = smov 4  }
  0x3a   : > { %1876 = dma.hbm_to_vmem [thread:$0]  (!%p2392_p6), %s2831_s6, 256, %s2385_s0, [#allocation7], %s2240_s14, %s2240_s14, %s2241_s15  }
  0x3b   : > { %s2031_s12 = scalar_lea.hbm %s2796_s8, 16 }
  0x3c   : > { %p2032_p5 = scmp.ne.s32.totalorder %s2796_s8, %s2031_s12  ;;  %p2038_p12 = scmp.lt.u32.totalorder %s2031_s12, %s2796_s8 }
  0x3e   : > { %p2034_p10 = pnand %p2032_p5, %p2408_p8 }
  0x40   : > { %p2035_p11 = pneg %p2034_p10 }
  0x42   : > { %p2040_p13 = pnand %p2038_p12, %p2035_p11 }
  0x44   : > { %2043 = shalt.err (!%p2040_p13)
}
  0x45   : > { %s2044_s0 = scalar_lea.vmem %s2396_s19, 16  ;;  %s2051_s3 = scalar_lea.vmem %s2396_s19, 32 }
  0x46   : > { %p2045_p0 = scmp.ne.s32.totalorder %s2396_s19, %s2044_s0  ;;  %p2052_p7 = scmp.lt.s32.totalorder %s2396_s19, %s2396_s19 }
  0x47   : > { %p2053_p9 = scmp.lt.s32.totalorder %s2051_s3, %s2044_s0 }
  0x48   : > { %p2047_p2 = pnand %p2045_p0, %p2408_p8 }
  0x49   : > { %p2054_p5 = por %p2053_p9, %p2052_p7 }
  0x4a   : > { %p2048_p4 = pneg %p2047_p2 }
  0x4c   : > { %p2055_p10 = pnand %p2054_p5, %p2048_p4 }
  0x4e   : > { %2058 = shalt.err (!%p2055_p10)
}
  0x4f   : > { %1882 = dma.hbm_to_vmem [thread:$0]  (!%p2392_p6), %s2796_s8, 16, %s2396_s19, [#allocation10]  }
  0x50   : > { %s2059_s15 = scalar_lea.hbm %s2795_s7, 16 }
  0x51   : > { %p2060_p11 = scmp.ne.s32.totalorder %s2795_s7, %s2059_s15  ;;  %p2066_p0 = scmp.lt.u32.totalorder %s2059_s15, %s2795_s7 }
  0x53   : > { %p2062_p12 = pnand %p2060_p11, %p2408_p8 }
  0x55   : > { %p2063_p13 = pneg %p2062_p12 }
  0x57   : > { %p2068_p2 = pnand %p2066_p0, %p2063_p13 }
  0x59   : > { %2071 = shalt.err (!%p2068_p2)
}
  0x5a   : > { %s2072_s13 = scalar_lea.vmem %s464_s27, 16  ;;  %s2079_s19 = scalar_lea.vmem %s464_s27, 32 }
  0x5b   : > { %p2073_p4 = scmp.ne.s32.totalorder %s464_s27, %s2072_s13  ;;  %p2080_p5 = scmp.lt.s32.totalorder %s464_s27, %s464_s27 }
  0x5c   : > { %p2081_p10 = scmp.lt.s32.totalorder %s2079_s19, %s2072_s13 }
  0x5d   : > { %p2075_p7 = pnand %p2073_p4, %p2408_p8 }
  0x5e   : > { %p2082_p3 = por %p2081_p10, %p2080_p5 }
  0x5f   : > { %p2076_p9 = pneg %p2075_p7 }
  0x61   : > { %p2083_p1 = pnand %p2082_p3, %p2076_p9 }
  0x63   : > { %2086 = shalt.err (!%p2083_p1)
}
  0x64   : > { %1879 = dma.hbm_to_vmem [thread:$0]  (!%p2392_p6), %s2795_s7, 16, %s464_s27, [#allocation7]  }
  0x65   : > { %s2242_s5 = smov [#allocation11]   ;;  %s2087_s15 = scalar_lea.hbm %s2797_s9, 16 }
  0x66   : > { %s485_s10 = sshll.u32 %s2242_s5, 4  ;;  %p2088_p11 = scmp.ne.s32.totalorder %s2797_s9, %s2087_s15  ;;  %s486_s10 = int_to_ptr.vmem [resolvable:$true] %s485_s10 }
  0x67   : > { %p2094_p12 = scmp.lt.u32.totalorder %s2087_s15, %s2797_s9 }
  0x68   : > { %p2090_p1 = pnand %p2088_p11, %p2408_p8 }
  0x6a   : > { %p2091_p3 = pneg %p2090_p1 }
  0x6c   : > { %p2096_p13 = pnand %p2094_p12, %p2091_p3 }
  0x6e   : > { %2099 = shalt.err (!%p2096_p13)
}
  0x6f   : > { %s2100_s27 = scalar_lea.vmem %s486_s10, 16  ;;  %s2107_s13 = scalar_lea.vmem %s486_s10, 32 }
  0x70   : > { %p2101_p0 = scmp.ne.s32.totalorder %s486_s10, %s2100_s27  ;;  %p2108_p7 = scmp.lt.s32.totalorder %s486_s10, %s486_s10 }
  0x71   : > { %p2109_p9 = scmp.lt.s32.totalorder %s2107_s13, %s2100_s27 }
  0x72   : > { %p2103_p2 = pnand %p2101_p0, %p2408_p8 }
  0x73   : > { %p2110_p5 = por %p2109_p9, %p2108_p7 }
  0x74   : > { %p2104_p4 = pneg %p2103_p2 }
  0x76   : > { %p2111_p10 = pnand %p2110_p5, %p2104_p4 }
  0x78   : > { %2114 = shalt.err (!%p2111_p10)
}
  0x79   : > { %1885 = dma.hbm_to_vmem [thread:$0]  (!%p2392_p6), %s2797_s9, 16, %s486_s10, [#allocation10]  }
  0x7a   : > { %s1673_s11 = sadd.s32 4294967294, %s2235_s26   ;;  %s46_s3 = sadd.s32 1, %s2231_s25 }
  0x7b   : > { %p48_p8 = scmp.ge.s32.totalorder %s46_s3, 2  ;;  %s53_s17 = sadd.s32 1, %s2223_s23 }
  0x7c   : > { %p60_p11 = scmp.ne.s32.totalorder %s2223_s23, %s2219_s22  ;;  %p61_p1 = scmp.eq.s32.totalorder %s2235_s26, 0 }
  0x7d   : > { %s2864_s3 = smov (%p48_p8, %s46_s3), 0  ;;  %p66_p12 = scmp.ne.s32.totalorder %s2219_s22, %s2215_s21 }
  0x7e   : > { %p2498_p3 = por %p61_p1, %p60_p11  ;;  %s50_s10 = ssub.s32 %s2231_s25, %s2864_s3 }
  0x7f   : > { %s2834_s12 = sadd.s32 4294967295, %s2235_s26   ;;  %p51_p13 = scmp.eq.s32.totalorder %s50_s10, 0 }
  0x80   : > { %p412_p6 = scmp.eq.s32.totalorder %s2834_s12, 1  ;;  %p2835_p0 = scmp.ne.s32.totalorder %s2828_s28, 0 }
  0x81   : > { %p418_p7 = scmp.eq.s32.totalorder %s1673_s11, 1  ;;  %p1898_p5 = scmp.lt.s32.totalorder %s2235_s26, 2 }
  0x82   : > { %p2510_p2 = por %p2835_p0, %p66_p12  ;;  %p2514_p4 = por %p412_p6, %p60_p11 }
  0x83   : > { %s2519_s16 = scalar_select %p51_p13, %s2223_s23, %s53_s17  }
  0x84   : > { %s2837_s15 = scalar_select %p2514_p4, 1, 0 }
  0x85   : > { %p2521_p9 = por %p418_p7, %p66_p12  ;;  %s514_s18 = sand.u32 1, %s2223_s23  }
  0x86   : > { %s1680_s20 = sshll.u32 %s2231_s25, 4  ;;  %s2839_s19 = sld [smem:[#allocation17_spill]] }
  0x87   : > { %s2838_s30 = scalar_select %p2521_p9, 1, 0 }
  0x88   : > { %s517_s10 = scalar_lea.vmem [#allocation3], %s514_s18  ;;  %p2537_p10 = pnand %p1898_p5, %p2498_p3 }
  0x89   : > { %s524_s11 = sshll.u32 %s517_s10, 4  ;;  %s515_s12 = scalar_lea.sflag [#allocation4], %s514_s18  ;;  %s2533_s11 = int_to_ptr.vmem [resolvable:$true] %s524_s11 }
  0x8a   : > { %p2117_p11 = pneg %p2537_p10 }
  0x8c   : > { %s2531_s0 = scalar_lea.hbm %s2839_s19, %s1680_s20  ;;  %s2120_s13 = scalar_lea.hbm %s2839_s19, 32 }
  0x8d   : > { %s2115_s6 = scalar_lea.hbm %s2531_s0, 16  ;;  %p2121_p3 = scmp.lt.u32.totalorder %s2531_s0, %s2839_s19 }
  0x8e   : > { %p2116_p8 = scmp.ne.s32.totalorder %s2531_s0, %s2115_s6  ;;  %p2122_p6 = scmp.lt.u32.totalorder %s2120_s13, %s2115_s6 }
  0x8f   : > { %p2124_p0 = scmp.lt.u32.totalorder %s2115_s6, %s2531_s0 }
  0x90   : > { %p2118_p1 = pnand %p2117_p11, %p2116_p8  ;;  %p2123_p13 = por %p2122_p6, %p2121_p3 }
  0x92   : > { %p2119_p12 = pneg %p2118_p1  ;;  %p2125_p7 = por %p2124_p0, %p2123_p13 }
  0x94   : > { %p2126_p5 = pnand %p2125_p7, %p2119_p12 }
  0x96   : > { %2129 = shalt.err (!%p2126_p5)
}
  0x97   : > { %s2130_s18 = scalar_lea.vmem %s2533_s11, 16  ;;  %s2243_s20 = smov [#allocation3]  }
  0x98   : > { %p2131_p8 = scmp.ne.s32.totalorder %s2533_s11, %s2130_s18  ;;  %s2135_s27 = sshll.u32 %s2243_s20, 4  ;;  %s2136_s27 = int_to_ptr.vmem [resolvable:$false] %s2135_s27 }
  0x99   : > { %s2137_s5 = scalar_lea.vmem %s2136_s27, 32  ;;  %p2138_p4 = scmp.lt.s32.totalorder %s2533_s11, %s2136_s27 }
  0x9a   : > { %p2133_p1 = pnand %p2131_p8, %p2117_p11  ;;  %p2139_p3 = scmp.lt.s32.totalorder %s2137_s5, %s2130_s18 }
  0x9c   : > { %p2134_p9 = pneg %p2133_p1  ;;  %p2140_p6 = por %p2139_p3, %p2138_p4 }
  0x9e   : > { %p2141_p13 = pnand %p2140_p6, %p2134_p9 }
  0xa0   : > { %2144 = shalt.err (!%p2141_p13)
}
  0xa1   : > { %1889 = dma.hbm_to_vmem [thread:$0]  (!%p2537_p10), %s2531_s0, 16, %s2533_s11, %s515_s12  }
  0xa2   : > { %p2841_p12 = scmp.ne.s32.totalorder %s2829_s29, 0 }
  0xa3   : > { %s2569_s6 = sand.u32 (!%p2841_p12), 1, %s2219_s22  }
  0xa4   : > { %540 = sbr.rel (%p2841_p12) target bundleno = 2718 (0xa9e), region = 84  ;;  %s543_s13 = scalar_lea.sflag (!%p2841_p12), [#allocation4], %s2569_s6 }
  0xa5   : > { %s545_s10 = scalar_lea.vmem (!%p2841_p12), [#allocation3], %s2569_s6 }
  0xab   : > { %2198 = dma.done.wait (%p2510_p2), %s543_s13, 16  }
  0xac   : > { %2200 = vsyncadd (%p2510_p2), %s543_s13, 4294967280  ;;  %p2842_p4 = scmp.ne.s32.totalorder %s2828_s28, 0 }
  0xae   : > { %2202 = dma.done.wait (%p2842_p4), [#allocation7], 272  }
  0xaf   : > { %2204 = vsyncadd (%p2842_p4), [#allocation7], 4294967024 }
  0xb0   : > { %2206 = dma.done.wait (%p2842_p4), [#allocation10], 32  }
  0xb1   : > { %2208 = vsyncadd (%p2842_p4), [#allocation10], 4294967264  ;;  %p613_p9 = scmp.lt.s32.totalorder %s2227_s24, 1  ;;  %v2244_v0 = vmov 0.0   ;;  %vm2245_vm0 = vmmov 0   ;;  %s2843_s1 = sld [smem:[#allocation18_spill]] }
  0xb2   : > { %1761 = vmatprep.subr.bf16.mxu1 %v2244_v0  ;;  %1765 = vmatprep.mubr.msk.bf16.mxu1 %vm2245_vm0, %v2244_v0  ;;  %s2844_s4 = sld [smem:[#allocation21_spill]]  ;;  %vm647_vm1 = vcmask 261120   ;;  %s2845_s2 = sld [smem:[#allocation19_spill]]  ;;  %vm692_vm2 = vcmask 519168   ;;  %vm774_vm3 = vcmask 64512   ;;  %vm844_vm4 = vcmask 1043456  }
  0xb3   : > { %s614_s29 = scalar_select %p613_p9, %s2227_s24, 1  ;;  %1777 = vmatprep.subr.bf16.mxu0 %v2244_v0  ;;  %1779 = vmatprep.mubr.msk.bf16.mxu0 %vm2245_vm0, %v2244_v0  ;;  %v1696_v33 = vld [vmem:[%s545_s10] ss:$0 sm:$0xff]  ;;  %vm1244_vm5 = vcmask 130048   ;;  %vm1247_vm6 = vcmask 195584   ;;  %vm1454_vm7 = vcmask 523264  }
  0xb4   : > { %s2846_s28 = sld [smem:[#allocation22_spill]]  ;;  %s2847_s12 = sld [smem:[#allocation20_spill]] }
  0xb5   : > { %s1687_s14 = sshll.u32 %s614_s29, 3  ;;  %s2246_s18 = smov 112  }
  0xb6   : > { %s2247_s20 = smov 120   ;;  %s2248_s27 = smov 104  }
  0xb7   : > { %s616_s11 = scalar_lea.vmem %s2843_s1, %s1687_s14  ;;  %s2249_s10 = smov 96  }
  0xb8   : > { %v1970_v1 = vld [vmem:[%s2844_s4] sm:$0xff]   ;;  %v1971_v2 = vld [vmem:[%s2844_s4 + $0x8] sm:$0xff]   ;;  %s2250_s5 = smov 80   ;;  %s2251_s13 = smov 72  }
  0xb9   : > { %1762 = vmatpush3.bf16.msra.mxu1 %v1970_v1  ;;  %v2602_v3 = vld [vmem:[%s616_s11] sm:$0xff]  ;;  %v1973_v6 = vld [vmem:[%s2845_s2 + $0x8] sm:$0xff]   ;;  %s2252_s29 = smov 88   ;;  %s2253_s14 = smov 8  }
  0xba   : > { %1763 = vmatprep.subr.bf16.mxu1 %v2244_v0  ;;  %v1972_v4 = vld [vmem:[%s2845_s2] sm:$0xff]   ;;  %v623_v5 = vpack.c.bf16 %v2602_v3, %v2602_v3  ;;  %s2254_s0 = smov 16   ;;  %s2854_s2 = sld [smem:[#allocation30_spill]] }
  0xbb   : > { %v1688_v7 = vld [vmem:[%s2846_s28] ss:$0 sm:$0xff]  ;;  %s2255_s28 = smov 24   ;;  %p2855_p10 = scmp.ne.s32.totalorder %s2837_s15, 0 }
  0xbc   : > { %v1692_v14 = vld [vmem:[%s2847_s12] ss:$0 sm:$0xff]  ;;  %s2848_s12 = sld [smem:[#allocation24_spill]] }
  0xbd   : > { %1764 = vmatpush3.bf16.msra.mxu1 %v1971_v2 }
  0xbe   : > { %1769 = vmatprep.subr.bf16.mxu1 %v2244_v0 }
  0xc0   : > { %1766 = vmatmul.mubr.msk.bf16.vlgmr.msra.gmra.mrb[0].mxu1 %vm647_vm1, %v623_v5 }
  0xc1   : > { %1770 = vmatpush3.bf16.msra.mxu1 %v1972_v4  ;;  %1773 = vmatprep.mubr.msk.bf16.mxu1 %vm2245_vm0, %v2244_v0 }
  0xc2   : > { %1771 = vmatprep.subr.bf16.mxu1 %v2244_v0 }
  0xc5   : > { %1772 = vmatpush3.bf16.msra.mxu1 %v1973_v6 }
  0xc6   : > { %1783 = vmatprep.subr.bf16.mxu1 %v2244_v0 }
  0xc8   : > { %1774 = vmatmul.mubr.msk.bf16.vlgmr.msra.gmra.mrb[4].mxu1 %vm647_vm1, %v623_v5 }
  0xc9   : > { %1785 = vmatprep.mubr.msk.bf16.mxu1 %vm2245_vm0, %v2244_v0 }
 0x193   : > { %v685_v8 = vpop.f32.mrb[0].mxu1 }
 0x194   : > { %v686_v9 = vadd.f32 %v1688_v7, %v685_v8  ;;  %v1767_v10 = vpop.f32.mrb[1].mxu1 }
 0x195   : > { %v688_v11 = vpop.f32.mrb[2].mxu1 }
 0x196   : > { %v691_v12 = vpack.c.bf16 %v686_v9, %v686_v9  ;;  %v1768_v13 = vpop.f32.mrb[3].mxu1 }
 0x198   : > { %693 = vst.msk [vmem:[#allocation2] sm:$0xf] %vm692_vm2, %v691_v12 }
 0x19b   : > { %v760_v15 = vpop.f32.mrb[4].mxu1 }
 0x19c   : > { %v1775_v16 = vpop.f32.mrb[5].mxu1  ;;  %v761_v18 = vadd.f32 %v1692_v14, %v760_v15 }
 0x19d   : > { %v763_v17 = vpop.f32.mrb[6].mxu1 }
 0x19e   : > { %v1776_v19 = vpop.f32.mrb[7].mxu1  ;;  %v766_v23 = vpack.c.bf16 %v761_v18, %v761_v18 }
 0x19f   : > { %v767_v20 = vld [vmem:[#allocation2] sm:$0xf] }
 0x1a0   : > { %v779_v21 = vsel %vm774_vm3, %v767_v20, 0  ;;  %v2629_v22 = vcombine.low %v767_v20, %v767_v20 }
 0x1a1   : > { %1778 = vmatpush3.bf16.xpose.msra.mxu0 %v779_v21 }
 0x1a2   : > { %1006 = vrot.lane.b32.xlu1 %v2629_v22, %s2246_s18  ;;  %892 = vrot.lane.b32.xlu0 %v2629_v22, %s2247_s20 }
 0x1a3   : > { %1789 = vmatprep.subr.bf16.mxu0 %v2244_v0 }
 0x1a6   : > { %1004 = vrot.lane.b32.xlu1 %v766_v23, %s2246_s18  ;;  %890 = vrot.lane.b32.xlu0 %v766_v23, %s2247_s20  ;;  %s2850_s20 = sld [smem:[#allocation25_spill]]  ;;  %s2853_s18 = sld [smem:[#allocation29_spill]] }
 0x1a8   : > { %1780 = vmatmul.mubr.msk.bf16.vlgmr.msra.gmra.mrb[0].mxu0 %vm774_vm3, %v766_v23 }
 0x1a9   : > { %1791 = vmatprep.mubr.msk.bf16.mxu0 %vm2245_vm0, %v2244_v0 }
 0x1aa   : > { %1118 = vrot.lane.b32.xlu1 %v766_v23, %s2248_s27  ;;  %1120 = vrot.lane.b32.xlu0 %v2629_v22, %s2248_s27 }
 0x214   : > { %v893_v24 = vpop.permute.xlu0 %892  ;;  %v1007_v26 = vpop.permute.xlu1 %1006 }
 0x215   : > { %v898_v25 = vsel %vm774_vm3, %v893_v24, 0  ;;  %v1012_v28 = vsel %vm774_vm3, %v1007_v26, 0 }
 0x216   : > { %1790 = vmatpush3.bf16.xpose.msra.mxu0 %v898_v25 }
 0x217   : > { %1801 = vmatprep.subr.bf16.mxu0 %v2244_v0 }
 0x218   : > { %v891_v27 = vpop.permute.xlu0 %890  ;;  %v1005_v30 = vpop.permute.xlu1 %1004 }
 0x21c   : > { %v1121_v29 = vpop.permute.xlu0 %1120  ;;  %v1119_v32 = vpop.permute.xlu1 %1118 }
 0x21d   : > { %1792 = vmatmul.mubr.msk.bf16.vlgmr.msra.gmra.mrb[4].mxu0 %vm774_vm3, %v891_v27  ;;  %v1126_v31 = vsel %vm774_vm3, %v1121_v29, 0 }
 0x21e   : > { %1802 = vmatpush3.bf16.xpose.msra.mxu0 %v1012_v28  ;;  %1803 = vmatprep.mubr.msk.bf16.mxu0 %vm2245_vm0, %v2244_v0 }
 0x21f   : > { %1813 = vmatprep.subr.bf16.mxu0 %v2244_v0 }
 0x225   : > { %1804 = vmatmul.mubr.msk.bf16.vlgmr.msra.gmra.mrb[8].mxu0 %vm774_vm3, %v1005_v30 }
 0x226   : > { %1814 = vmatpush3.bf16.xpose.msra.mxu0 %v1126_v31  ;;  %1815 = vmatprep.mubr.msk.bf16.mxu0 %vm2245_vm0, %v2244_v0 }
 0x227   : > { %1825 = vmatprep.subr.bf16.mxu0 %v2244_v0 }
 0x22d   : > { %1816 = vmatmul.mubr.msk.bf16.vlgmr.msra.gmra.mrb[12].mxu0 %vm774_vm3, %v1119_v32 }
 0x22e   : > { %1829 = vmatprep.mubr.msk.bf16.mxu0 %vm2245_vm0, %v2244_v0 }
 0x27b   : > { %v815_v34 = vpop.f32.mrb[0].mxu0 }
 0x27c   : > { %v816_v35 = vadd.f32 %v1696_v33, %v815_v34  ;;  %v1781_v36 = vpop.f32.mrb[1].mxu0 }
 0x27d   : > { %v818_v37 = vpop.f32.mrb[2].mxu0 }
 0x27e   : > { %v1782_v38 = vpop.f32.mrb[3].mxu0  ;;  %v821_v39 = vsel %vm774_vm3, %v816_v35, -inf }
 0x27f   : > { %822 = vmax.xlane.f32.xlu0 %v821_v39 }
 0x2f0   : > { %v934_v40 = vpop.f32.mrb[4].mxu0 }
 0x2f1   : > { %v935_v41 = vadd.f32 %v1696_v33, %v934_v40  ;;  %v1793_v42 = vpop.f32.mrb[5].mxu0 }
 0x2f2   : > { %v937_v43 = vpop.f32.mrb[6].mxu0 }
 0x2f3   : > { %v1794_v44 = vpop.f32.mrb[7].mxu0  ;;  %v940_v45 = vsel %vm774_vm3, %v935_v41, -inf }
 0x2f4   : > { %941 = vmax.xlane.f32.xlu1 %v940_v45 }
 0x2f8   : > { %v1048_v46 = vpop.f32.mrb[8].mxu0 }
 0x2f9   : > { %v1049_v47 = vadd.f32 %v1696_v33, %v1048_v46  ;;  %v1805_v48 = vpop.f32.mrb[9].mxu0 }
 0x2fa   : > { %v1051_v49 = vpop.f32.mrb[10].mxu0 }
 0x2fb   : > { %v1806_v50 = vpop.f32.mrb[11].mxu0  ;;  %v1054_v51 = vsel %vm774_vm3, %v1049_v47, -inf }
 0x2fc   : > { %1055 = vmax.xlane.f32.xlu0 %v1054_v51 }
 0x300   : > { %v1162_v52 = vpop.f32.mrb[12].mxu0 }
 0x301   : > { %v1163_v53 = vadd.f32 %v1696_v33, %v1162_v52  ;;  %v1817_v54 = vpop.f32.mrb[13].mxu0 }
 0x302   : > { %v1165_v55 = vpop.f32.mrb[14].mxu0 }
 0x303   : > { %v1818_v56 = vpop.f32.mrb[15].mxu0  ;;  %v1168_v57 = vsel %vm774_vm3, %v1163_v53, -inf }
 0x304   : > { %1169 = vmax.xlane.f32.xlu0 %v1168_v57  ;;  %v1975_v56 = vld [vmem:[#allocation6] sm:$0xff]  }
 0x305   : > { %1826 = vmatpush3.bf16.msra.mxu0 %v1975_v56 }
 0x306   : > { %1827 = vmatprep.subr.bf16.mxu0 %v2244_v0 }
 0x30c   : > { %v823_v58 = vpop.xlane.xlu0 %822 }
 0x30d   : > { %v824_v59 = vsub.f32 %v816_v35, %v823_v58  ;;  %v1976_v58 = vld [vmem:[#allocation6 + $0x8] sm:$0xff]  }
 0x30e   : > { %1828 = vmatpush3.bf16.msra.mxu0 %v1976_v58 }
 0x30f   : > { %v825_v60 = vmul.f32 1.442695, %v824_v59  ;;  %1841 = vmatprep.subr.bf16.mxu0 %v2244_v0 }
 0x311   : > { %1983 = vpow2.f32 %v825_v60 }
 0x31b   : > { %v1984_v61 = vpop.eup %1983 }
 0x31c   : > { %v827_v62 = vsel %vm774_vm3, %v1984_v61, 0.0 }
 0x31d   : > { %828 = vadd.xlane.f32.xlu1 %v827_v62 }
 0x32e   : > { %839 = vrot.lane.b32.xlu1 %v2629_v22, %s2249_s10 }
 0x381   : > { %v942_v63 = vpop.xlane.xlu1 %941 }
 0x382   : > { %v943_v1 = vsub.f32 %v935_v41, %v942_v63 }
 0x384   : > { %v944_v2 = vmul.f32 1.442695, %v943_v1 }
 0x386   : > { %1985 = vpow2.f32 %v944_v2 }
 0x389   : > { %v1056_v4 = vpop.xlane.xlu0 %1055 }
 0x38a   : > { %v1057_v5 = vsub.f32 %v1049_v47, %v1056_v4 }
 0x38c   : > { %v1058_v6 = vmul.f32 1.442695, %v1057_v5 }
 0x38e   : > { %1987 = vpow2.f32 %v1058_v6 }
 0x390   : > { %v1986_v7 = vpop.eup %1985 }
 0x391   : > { %v1170_v8 = vpop.xlane.xlu0 %1169  ;;  %v946_v9 = vsel %vm774_vm3, %v1986_v7, 0.0 }
 0x392   : > { %v1171_v10 = vsub.f32 %v1163_v53, %v1170_v8  ;;  %947 = vadd.xlane.f32.xlu0 %v946_v9 }
 0x394   : > { %v1172_v11 = vmul.f32 1.442695, %v1171_v10 }
 0x396   : > { %1989 = vpow2.f32 %v1172_v11 }
 0x398   : > { %v1988_v12 = vpop.eup %1987 }
 0x399   : > { %v1060_v13 = vsel %vm774_vm3, %v1988_v12, 0.0 }
 0x39a   : > { %1061 = vadd.xlane.f32.xlu1 %v1060_v13 }
 0x3a0   : > { %v1990_v14 = vpop.eup %1989 }
 0x3a1   : > { %v1174_v15 = vsel %vm774_vm3, %v1990_v14, 0.0 }
 0x3a2   : > { %1175 = vadd.xlane.f32.xlu0 %v1174_v15 }
 0x3aa   : > { %v829_v16 = vpop.xlane.xlu1 %828 }
 0x3ab   : > { %1991 = vrcp.f32 %v829_v16  ;;  %1069 = vrot.lane.b32.xlu1 %v2629_v22, %s2250_s5  ;;  %s2849_s5 = sld [smem:[#allocation26_spill]] }
 0x3ae   : > { %v840_v17 = vpop.permute.xlu1 %839 }
 0x3af   : > { %v846_v18 = vsel %vm844_vm4, %v840_v17, 0  ;;  %1183 = vrot.lane.b32.xlu1 %v2629_v22, %s2251_s13  ;;  %s2851_s13 = sld [smem:[#allocation27_spill]] }
 0x3b0   : > { %1784 = vmatpush3.bf16.msra.mxu1 %v846_v18  ;;  %v1706_v18 = vld [vmem:[#allocation8] ss:$0 sm:$0xff] }
 0x3b1   : > { %1795 = vmatprep.subr.bf16.mxu1 %v2244_v0 }
 0x3b5   : > { %v1992_v19 = vpop.eup %1991 }
 0x3b6   : > { %v831_v20 = vmul.f32 %v1992_v19, %v829_v16 }
 0x3b8   : > { %v832_v21 = vsub.f32 2.0, %v831_v20  ;;  %955 = vrot.lane.b32.xlu0 %v2629_v22, %s2252_s29  ;;  %s1686_s29 = sshll.u32 %s2569_s6, 3 }
 0x3b9   : > { %s612_s27 = scalar_lea.vmem [#allocation12], %s1686_s29 }
 0x3ba   : > { %v833_v23 = vmul.f32 %v1992_v19, %v832_v21  ;;  %s1544_s10 = sshll.u32 %s612_s27, 4  ;;  %s2740_s10 = int_to_ptr.vmem [resolvable:$true] %s1544_s10 }
 0x3bc   : > { %v834_v24 = vmul.f32 %v1984_v61, %v833_v23 }
 0x3be   : > { %v835_v25 = vpack.c.bf16 %v834_v24, %v834_v24 }
 0x3c0   : > { %1786 = vmatmul.mubr.msk.bf16.vlgmr.msra.gmra.mrb[8].mxu1 %vm774_vm3, %v835_v25 }
 0x3c1   : > { %1797 = vmatprep.mubr.msk.bf16.mxu1 %vm2245_vm0, %v2244_v0 }
 0x41f   : > { %v948_v26 = vpop.xlane.xlu0 %947 }
 0x420   : > { %1993 = vrcp.f32 %v948_v26 }
 0x427   : > { %v1062_v27 = vpop.xlane.xlu1 %1061 }
 0x428   : > { %1995 = vrcp.f32 %v1062_v27 }
 0x42a   : > { %v1994_v28 = vpop.eup %1993 }
 0x42b   : > { %v950_v29 = vmul.f32 %v1994_v28, %v948_v26  ;;  %v1070_v38 = vpop.permute.xlu1 %1069 }
 0x42c   : > { %v1075_v41 = vsel %vm844_vm4, %v1070_v38, 0  ;;  %v1710_v38 = vld [vmem:[#allocation9] ss:$0 sm:$0xff] }
 0x42d   : > { %v951_v30 = vsub.f32 2.0, %v950_v29 }
 0x42f   : > { %v952_v31 = vmul.f32 %v1994_v28, %v951_v30  ;;  %v1176_v32 = vpop.xlane.xlu0 %1175  ;;  %v1184_v45 = vpop.permute.xlu1 %1183 }
 0x430   : > { %1997 = vrcp.f32 %v1176_v32  ;;  %v1189_v49 = vsel %vm844_vm4, %v1184_v45, 0  ;;  %v1982_v45 = vld [vmem:[%s2849_s5 + $0x18] sm:$0xff]  }
 0x431   : > { %v953_v22 = vmul.f32 %v1986_v7, %v952_v31 }
 0x432   : > { %v1996_v33 = vpop.eup %1995 }
 0x433   : > { %v1064_v34 = vmul.f32 %v1996_v33, %v1062_v27  ;;  %v956_v35 = vpop.permute.xlu0 %955  ;;  %v954_v39 = vpack.c.bf16 %v953_v22, %v953_v22  ;;  %v1980_v22 = vld [vmem:[%s2849_s5 + $0x8] sm:$0xff]  }
 0x434   : > { %v961_v36 = vsel %vm844_vm4, %v956_v35, 0 }
 0x435   : > { %v1065_v37 = vsub.f32 2.0, %v1064_v34  ;;  %1796 = vmatpush3.bf16.msra.mxu1 %v961_v36 }
 0x436   : > { %1807 = vmatprep.subr.bf16.mxu1 %v2244_v0 }
 0x437   : > { %v1066_v40 = vmul.f32 %v1996_v33, %v1065_v37  ;;  %v1978_v33 = vld [vmem:[%s2848_s12 + $0x8] sm:$0xff]  }
 0x438   : > { %1798 = vmatmul.mubr.msk.bf16.vlgmr.msra.gmra.mrb[12].mxu1 %vm774_vm3, %v954_v39 }
 0x439   : > { %1808 = vmatpush3.bf16.msra.mxu1 %v1075_v41  ;;  %1809 = vmatprep.mubr.msk.bf16.mxu1 %vm2245_vm0, %v2244_v0  ;;  %v1067_v43 = vmul.f32 %v1988_v12, %v1066_v40  ;;  %v1711_v40 = vld [vmem:[#allocation11] ss:$0 sm:$0xff] }
 0x43a   : > { %v1998_v42 = vpop.eup %1997  ;;  %1819 = vmatprep.subr.bf16.mxu1 %v2244_v0 }
 0x43b   : > { %v1178_v44 = vmul.f32 %v1998_v42, %v1176_v32  ;;  %v1068_v47 = vpack.c.bf16 %v1067_v43, %v1067_v43  ;;  %v1977_v32 = vld [vmem:[%s2848_s12] sm:$0xff]  }
 0x43d   : > { %v1179_v46 = vsub.f32 2.0, %v1178_v44  ;;  %v1981_v44 = vld [vmem:[%s2849_s5 + $0x10] sm:$0xff]  }
 0x43f   : > { %v1180_v48 = vmul.f32 %v1998_v42, %v1179_v46  ;;  %v1712_v46 = vld [vmem:[%s2850_s20] ss:$0 sm:$0xff]  ;;  %s1725_s20 = sshll.u32 %s2227_s24, 7  ;;  %s2256_s24 = smov [#allocation12]  }
 0x440   : > { %1810 = vmatmul.mubr.msk.bf16.vlgmr.msra.gmra.mrb[16].mxu1 %vm774_vm3, %v1068_v47  ;;  %s2738_s4 = scalar_lea.hbm %s2854_s2, %s1725_s20  ;;  %s2149_s29 = sshll.u32 %s2256_s24, 4  ;;  %s2150_s29 = int_to_ptr.vmem [resolvable:$false] %s2149_s29 }
 0x441   : > { %1820 = vmatpush3.bf16.msra.mxu1 %v1189_v49  ;;  %1821 = vmatprep.mubr.msk.bf16.mxu1 %vm2245_vm0, %v2244_v0  ;;  %v1181_v50 = vmul.f32 %v1990_v14, %v1180_v48  ;;  %p2152_p7 = scmp.lt.s32.totalorder %s2740_s10, %s2150_s29 }
 0x442   : > { %1833 = vmatprep.subr.bf16.mxu1 %v2244_v0 }
 0x443   : > { %v1182_v51 = vpack.c.bf16 %v1181_v50, %v1181_v50 }
 0x448   : > { %1822 = vmatmul.mubr.msk.bf16.vlgmr.msra.gmra.mrb[20].mxu1 %vm774_vm3, %v1182_v51 }
 0x449   : > { %1837 = vmatprep.mubr.msk.bf16.mxu1 %vm2245_vm0, %v2244_v0  ;;  %1834 = vmatpush3.bf16.msra.mxu1 %v1977_v32 }
 0x44a   : > { %1835 = vmatprep.subr.bf16.mxu1 %v2244_v0 }
 0x44d   : > { %1836 = vmatpush3.bf16.msra.mxu1 %v1978_v33 }
 0x493   : > { %v882_v52 = vpop.f32.mrb[8].mxu1 }
 0x494   : > { %v1787_v53 = vpop.f32.mrb[9].mxu1  ;;  %v888_v12 = vpack.c.bf16 %v882_v52, %v882_v52 }
 0x495   : > { %v885_v54 = vpop.f32.mrb[10].mxu1 }
 0x496   : > { %v1788_v55 = vpop.f32.mrb[11].mxu1 }
 0x50b   : > { %v997_v57 = vpop.f32.mrb[12].mxu1 }
 0x50c   : > { %v1003_v59 = vpack.c.bf16 %v997_v57, %v997_v57  ;;  %v1799_v60 = vpop.f32.mrb[13].mxu1 }
 0x50d   : > { %v1000_v61 = vpop.f32.mrb[14].mxu1 }
 0x50e   : > { %1233 = vrot.lane.b32.xlu0 %v1003_v59, %s2253_s14  ;;  %v1800_v62 = vpop.f32.mrb[15].mxu1  ;;  %s1530_s14 = scalar_lea.sflag [#allocation5], %s2569_s6 }
 0x513   : > { %v1111_v63 = vpop.f32.mrb[16].mxu1 }
 0x514   : > { %v1117_v1 = vpack.c.bf16 %v1111_v63, %v1111_v63  ;;  %v1811_v2 = vpop.f32.mrb[17].mxu1 }
 0x515   : > { %v1114_v4 = vpop.f32.mrb[18].mxu1 }
 0x516   : > { %1236 = vrot.lane.b32.xlu1 %v1117_v1, %s2254_s0  ;;  %v1812_v5 = vpop.f32.mrb[19].mxu1  ;;  %s2145_s0 = scalar_lea.vmem %s2740_s10, 128 }
 0x517   : > { %p2146_p2 = scmp.ne.s32.totalorder %s2740_s10, %s2145_s0 }
 0x519   : > { %p2147_p11 = pnand %p2146_p2, %p2855_p10 }
 0x51b   : > { %v1225_v6 = vpop.f32.mrb[20].mxu1  ;;  %p2148_p0 = pneg %p2147_p11 }
 0x51c   : > { %v1231_v7 = vpack.c.bf16 %v1225_v6, %v1225_v6  ;;  %v1823_v8 = vpop.f32.mrb[21].mxu1 }
 0x51d   : > { %v1228_v9 = vpop.f32.mrb[22].mxu1 }
 0x51e   : > { %1239 = vrot.lane.b32.xlu0 %v1231_v7, %s2255_s28  ;;  %v1824_v10 = vpop.f32.mrb[23].mxu1  ;;  %s2852_s28 = sld [smem:[#allocation28_spill]] }
 0x51f   : > { %v1723_v10 = vld [vmem:[%s2853_s18] ss:$0 sm:$0xff] }
 0x524   : > { %v1722_v8 = vld [vmem:[%s2852_s28] ss:$0 sm:$0xff]  ;;  %s2151_s28 = scalar_lea.vmem %s2150_s29, 256 }
 0x525   : > { %p2153_p5 = scmp.lt.s32.totalorder %s2151_s28, %s2145_s0 }
 0x527   : > { %p2154_p8 = por %p2153_p5, %p2152_p7 }
 0x529   : > { %p2155_p1 = pnand %p2154_p8, %p2148_p0 }
 0x580   : > { %v1234_v11 = vpop.permute.xlu0 %1233 }
 0x581   : > { %v1243_v14 = vsel %vm774_vm3, %v888_v12, %v1234_v11 }
 0x588   : > { %v1237_v13 = vpop.permute.xlu1 %1236 }
 0x589   : > { %v1246_v15 = vsel %vm1244_vm5, %v1243_v14, %v1237_v13 }
 0x590   : > { %v1240_v16 = vpop.permute.xlu0 %1239 }
 0x591   : > { %v1249_v17 = vsel %vm1247_vm6, %v1246_v15, %v1240_v16 }
 0x592   : > { %1830 = vmatmul.mubr.msk.bf16.vlgmr.msra.gmra.mrb[16].mxu0 %vm647_vm1, %v1249_v17 }
 0x593   : > { %1849 = vmatprep.mubr.msk.bf16.mxu0 %vm2245_vm0, %v2244_v0 }
 0x665   : > { %v1309_v19 = vpop.f32.mrb[16].mxu0 }
 0x666   : > { %v1310_v20 = vadd.f32 %v1706_v18, %v1309_v19  ;;  %v1831_v21 = vpop.f32.mrb[17].mxu0 }
 0x667   : > { %v1312_v23 = vpop.f32.mrb[18].mxu0 }
 0x668   : > { %v1832_v24 = vpop.f32.mrb[19].mxu0  ;;  %v1315_v25 = vadd.f32 %v1310_v20, %v2602_v3  ;;  %v1979_v3 = vld [vmem:[%s2849_s5] sm:$0xff]  }
 0x669   : > { %1842 = vmatpush3.bf16.msra.mxu0 %v1979_v3 }
 0x66a   : > { %v1318_v26 = vsel %vm647_vm1, %v1315_v25, 0.0  ;;  %1843 = vmatprep.subr.bf16.mxu0 %v2244_v0 }
 0x66b   : > { %1319 = vadd.xlane.f32.xlu1 %v1318_v26 }
 0x66d   : > { %1844 = vmatpush3.bf16.msra.mxu0 %v1980_v22 }
 0x66e   : > { %1845 = vmatprep.subr.bf16.mxu0 %v2244_v0 }
 0x671   : > { %1846 = vmatpush3.bf16.msra.mxu0 %v1981_v44 }
 0x672   : > { %1847 = vmatprep.subr.bf16.mxu0 %v2244_v0  ;;  %v1716_v0 = vld [vmem:[%s2851_s13] ss:$0 sm:$0xff] }
 0x675   : > { %1848 = vmatpush3.bf16.msra.mxu0 %v1982_v45 }
 0x6f8   : > { %v1320_v27 = vpop.xlane.xlu1 %1319 }
 0x6f9   : > { %v1322_v28 = vmul.f32 0.03125, %v1320_v27 }
 0x6fb   : > { %v1323_v29 = vsub.f32 %v1315_v25, %v1322_v28 }
 0x6fd   : > { %v1324_v30 = vmul.f32 %v1323_v29, %v1323_v29 }
 0x6ff   : > { %v1325_v31 = vsel %vm647_vm1, %v1324_v30, 0.0 }
 0x700   : > { %1326 = vadd.xlane.f32.xlu0 %v1325_v31 }
 0x78d   : > { %v1327_v34 = vpop.xlane.xlu0 %1326 }
 0x78e   : > { %v1328_v35 = vmul.f32 0.03125, %v1327_v34 }
 0x790   : > { %v1329_v36 = vadd.f32 1e-05, %v1328_v35 }
 0x792   : > { %1999 = vrsqrt.f32 %v1329_v36 }
 0x79c   : > { %v2000_v37 = vpop.eup %1999 }
 0x79d   : > { %v1331_v39 = vmul.f32 %v2000_v37, %v1323_v29 }
 0x79f   : > { %v1338_v41 = vmul.f32 %v1710_v38, %v1331_v39 }
 0x7a1   : > { %v1345_v42 = vadd.f32 %v1711_v40, %v1338_v41 }
 0x7a3   : > { %v1346_v43 = vpack.c.bf16 %v1345_v42, %v1345_v42 }
 0x7a5   : > { %1838 = vmatmul.mubr.msk.bf16.vlgmr.msra.gmra.mrb[24].mxu1 %vm647_vm1, %v1346_v43 }
 0x878   : > { %v1407_v47 = vpop.f32.mrb[24].mxu1 }
 0x879   : > { %v1408_v48 = vadd.f32 %v1712_v46, %v1407_v47  ;;  %v1839_v49 = vpop.f32.mrb[25].mxu1 }
 0x87a   : > { %v1410_v50 = vpop.f32.mrb[26].mxu1 }
 0x87b   : > { %v1413_v51 = vmax.f32 %v1408_v48, 0.0  ;;  %v1840_v52 = vpop.f32.mrb[27].mxu1 }
 0x87d   : > { %v1414_v53 = vpack.c.bf16 %v1413_v51, %v1413_v51 }
 0x87f   : > { %1850 = vmatmul.mubr.msk.bf16.vlgmr.msra.gmra.mrb[20].mxu0 %vm1454_vm7, %v1414_v53 }
 0x952   : > { %v1492_v54 = vpop.f32.mrb[20].mxu0 }
 0x953   : > { %v1493_v55 = vadd.f32 %v1716_v0, %v1492_v54  ;;  %v1851_v56 = vpop.f32.mrb[21].mxu0 }
 0x954   : > { %v1495_v57 = vpop.f32.mrb[22].mxu0 }
 0x955   : > { %v1852_v58 = vpop.f32.mrb[23].mxu0  ;;  %v1498_v59 = vadd.f32 %v1493_v55, %v1345_v42 }
 0x957   : > { %v1501_v60 = vsel %vm647_vm1, %v1498_v59, 0.0 }
 0x958   : > { %1502 = vadd.xlane.f32.xlu0 %v1501_v60 }
 0x9e5   : > { %v1503_v61 = vpop.xlane.xlu0 %1502 }
 0x9e6   : > { %v1504_v62 = vmul.f32 0.03125, %v1503_v61 }
 0x9e8   : > { %v1505_v63 = vsub.f32 %v1498_v59, %v1504_v62 }
 0x9ea   : > { %v1506_v1 = vmul.f32 %v1505_v63, %v1505_v63 }
 0x9ec   : > { %v1507_v2 = vsel %vm647_vm1, %v1506_v1, 0.0 }
 0x9ed   : > { %1508 = vadd.xlane.f32.xlu1 %v1507_v2 }
 0xa7a   : > { %v1509_v4 = vpop.xlane.xlu1 %1508 }
 0xa7b   : > { %v1510_v5 = vmul.f32 0.03125, %v1509_v4 }
 0xa7d   : > { %v1511_v6 = vadd.f32 1e-05, %v1510_v5 }
 0xa7f   : > { %2001 = vrsqrt.f32 %v1511_v6 }
 0xa89   : > { %v2002_v7 = vpop.eup %2001 }
 0xa8a   : > { %v1513_v9 = vmul.f32 %v2002_v7, %v1505_v63 }
 0xa8c   : > { %v1520_v11 = vmul.f32 %v1722_v8, %v1513_v9 }
 0xa8e   : > { %v1527_v12 = vadd.f32 %v1723_v10, %v1520_v11 }
 0xa90   : > { %1528 = vst.msk [vmem:[%s612_s27] sm:$0xff] %vm647_vm1, %v1527_v12 }
 0xa91   : > { %2158 = shalt.err (!%p2155_p1)
}
 0xa92   : > { %s2159_s1 = scalar_lea.hbm %s2738_s4, 128  ;;  %s2163_s17 = scalar_lea.hbm %s2854_s2, 256 }
 0xa93   : > { %p2160_p3 = scmp.ne.s32.totalorder %s2738_s4, %s2159_s1  ;;  %p2164_p12 = scmp.lt.u32.totalorder %s2738_s4, %s2854_s2 }
 0xa94   : > { %p2165_p4 = scmp.lt.u32.totalorder %s2163_s17, %s2159_s1  ;;  %p2167_p2 = scmp.lt.u32.totalorder %s2159_s1, %s2738_s4 }
 0xa95   : > { %p2161_p6 = pnand %p2160_p3, %p2855_p10 }
 0xa96   : > { %p2166_p9 = por %p2165_p4, %p2164_p12 }
 0xa97   : > { %p2162_p13 = pneg %p2161_p6 }
 0xa98   : > { %p2168_p11 = por %p2167_p2, %p2166_p9 }
 0xa9a   : > { %p2169_p0 = pnand %p2168_p11, %p2162_p13 }
 0xa9c   : > { %2172 = shalt.err (!%p2169_p0)
}
 0xa9d   : > { %1871 = dma.vmem_to_hbm [thread:$0]  (%p2855_p10), %s2740_s10, 128, %s2738_s4, %s1530_s14  }
 0xa9e PF: > { %s1556_s27 = sand.u32 1, %s2215_s21   ;;  %p2856_p7 = scmp.ne.s32.totalorder %s2838_s30, 0 }
 0xa9f   : > { %p2857_p5 = scmp.ge.s32.totalorder %s2235_s26, 2  ;;  %s1557_s13 = scalar_lea.sflag [#allocation5], %s1556_s27 }
 0xaa1   : > { %p1891_p8 = pnand %p2857_p5, %p2856_p7 }
 0xaa3   : > { %2210 = dma.done.wait (!%p1891_p8), %s1557_s13, 128  }
 0xaa4   : > { %2212 = vsyncadd (!%p1891_p8), %s1557_s13, 4294967168  ;;  %s34_s26 = sadd.s32 1, %s2235_s26   ;;  %s2858_s21 = smov %s2219_s22 }
 0xaa5   : > { %p31_p1 = scmp.ge.s32.totalorder %s34_s26, 4   ;;  %s2859_s22 = smov %s2223_s23 }
 0xaa6   : > { %s2860_s23 = smov %s2519_s16  ;;  %s2861_s24 = smov %s2231_s25 }
 0xaa7   : > { %s2862_s25 = smov %s2864_s3  ;;  %33 = sbr.rel (!%p31_p1) target bundleno = 23 (0x17), region = 153 }
 0xaae   :  { %1562 = vsyncpa [#allocation4], 1 }
 0xaaf   :  { %1564 = vsyncpa [#allocation4 + $0x1], 1 }
 0xab0   :  { %1565 = vsyncpa [#allocation7], 1 }
 0xab1   :  { %1566 = vsyncpa [#allocation10], 1 }
 0xab2   :  { %1567 = vsyncpa [#allocation5], 1 }
 0xab3   :  { %1569 = vsyncpa [#allocation5 + $0x1], 1 }

// kernel: tpu_custom_call.1
= control target key start
LH: loop header
LB: loop body
LE: loop exit
PB: predicated region body
PF: predicated region fallthrough
CT: control target
= control target key end

     0   :  { %s2788_s0 = inlined_call_operand.hbm [shape: f32[2,1,8], index: 0, kind: input, shape index: {}]   ;;  %s2789_s1 = inlined_call_operand.vmem [shape: f32[2,8,32], index: 1, kind: input, shape index: {}]   ;;  %s2790_s2 = inlined_call_operand.vmem [shape: bf16[32,32], index: 2, kind: input, shape index: {}]   ;;  %s2791_s3 = inlined_call_operand.vmem [shape: f32[1,32], index: 3, kind: input, shape index: {}]   ;;  %s2792_s4 = inlined_call_operand.vmem [shape: bf16[32,64], index: 4, kind: input, shape index: {}]   ;;  %s2793_s5 = inlined_call_operand.vmem [shape: f32[1,64], index: 5, kind: input, shape index: {}]   ;;  %s2794_s6 = inlined_call_operand.hbm [shape: bf16[32,32], index: 6, kind: input, shape index: {}]   ;;  %s2795_s7 = inlined_call_operand.hbm [shape: f32[1,32], index: 7, kind: input, shape index: {}]   ;;  %s2796_s8 = inlined_call_operand.hbm [shape: f32[1,32], index: 8, kind: input, shape index: {}]   ;;  %s2797_s9 = inlined_call_operand.hbm [shape: f32[1,32], index: 9, kind: input, shape index: {}]   ;;  %s2798_s10 = inlined_call_operand.vmem [shape: bf16[32,64], index: 10, kind: input, shape index: {}]   ;;  %s2799_s11 = inlined_call_operand.vmem [shape: f32[1,64], index: 11, kind: input, shape index: {}]   ;;  %s2800_s12 = inlined_call_operand.vmem [shape: bf16[64,32], index: 12, kind: input, shape index: {}]   ;;  %s2801_s13 = inlined_call_operand.vmem [shape: f32[1,32], index: 13, kind: input, shape index: {}]   ;;  %s2802_s14 = inlined_call_operand.vmem [shape: f32[1,32], index: 14, kind: input, shape index: {}]   ;;  %s2803_s15 = inlined_call_operand.vmem [shape: f32[1,32], index: 15, kind: input, shape index: {}]   ;;  %s2804_s16 = inlined_call_operand.hbm [shape: f32[2,8,32], index: 16, kind: output, shape index: {}]  }
   0x1   :  { %2814 = sst [smem:[#allocation17_spill]] %s2788_s0 }
   0x2   :  { %2815 = sst [smem:[#allocation18_spill]] %s2789_s1 }
   0x3   :  { %2816 = sst [smem:[#allocation19_spill]] %s2790_s2 }
   0x4   :  { %2817 = sst [smem:[#allocation20_spill]] %s2791_s3 }
   0x5   :  { %2818 = sst [smem:[#allocation21_spill]] %s2792_s4 }
   0x6   :  { %2819 = sst [smem:[#allocation22_spill]] %s2793_s5 }
   0x7   :  { %2820 = sst [smem:[#allocation23_spill]] %s2794_s6 }
   0x8   :  { %2821 = sst [smem:[#allocation24_spill]] %s2798_s10 }
   0x9   :  { %2822 = sst [smem:[#allocation25_spill]] %s2799_s11 }
   0xa   :  { %2823 = sst [smem:[#allocation26_spill]] %s2800_s12 }
   0xb   :  { %2824 = sst [smem:[#allocation27_spill]] %s2801_s13 }
   0xc   :  { %2825 = sst [smem:[#allocation28_spill]] %s2802_s14 }
   0xd   :  { %2826 = sst [smem:[#allocation29_spill]] %s2803_s15 }
   0xe   :  { %2827 = sst [smem:[#allocation30_spill]] %s2804_s16 }
   0xf   :  { %21 = vsyncpa [#allocation4], 0 }
  0x10   :  { %23 = vsyncpa [#allocation4 + $0x1], 0 }
  0x11   :  { %24 = vsyncpa [#allocation7], 0 }
  0x12   :  { %25 = vsyncpa [#allocation10], 0 }
  0x13   :  { %26 = vsyncpa [#allocation5], 0 }
  0x14   :  { %28 = vsyncpa [#allocation5 + $0x1], 0  ;;  %s2342_s21 = smov 0   ;;  %s2344_s22 = smov 0  }
  0x15   :  { %s2346_s23 = smov 0   ;;  %s2348_s24 = smov 0  }
  0x16   :  { %s2350_s25 = smov 0   ;;  %s2352_s26 = smov 0  }
  0x17 LB: > { %s2806_s27 = sadd.s32 4294967295, %s2235_s26   ;;  %p1674_p0 = scmp.ge.s32.totalorder %s2235_s26, 1  ;;  %s2235_s26 = sphi %s2352_s26, %s34_s26   ;;  %s2231_s25 = sphi %s2350_s25, %s2862_s25   ;;  %s2227_s24 = sphi %s2348_s24, %s2861_s24   ;;  %s2223_s23 = sphi %s2346_s23, %s2860_s23   ;;  %s2219_s22 = sphi %s2344_s22, %s2859_s22   ;;  %s2215_s21 = sphi %s2342_s21, %s2858_s21  }
  0x18   : > { %p2376_p1 = scmp.eq.s32.totalorder %s2806_s27, 0  ;;  %p425_p2 = scmp.lt.s32.totalorder %s2235_s26, 3 }
  0x19   : > { %s2237_s30 = smov [#allocation6]   ;;  %s2238_s18 = smov [#allocation9]  }
  0x1a   : > { %s2828_s28 = scalar_select %p2376_p1, 1, 0 }
  0x1b   : > { %p2381_p3 = pnand %p1674_p0, %p425_p2  ;;  %s449_s0 = sshll.u32 %s2237_s30, 4  ;;  %s2385_s0 = int_to_ptr.vmem [resolvable:$true] %s449_s0 }
  0x1c   : > { %s474_s19 = sshll.u32 %s2238_s18, 4  ;;  %s2239_s20 = smov [#allocation8]   ;;  %s2396_s19 = int_to_ptr.vmem [resolvable:$true] %s474_s19 }
  0x1d   : > { %s2829_s29 = scalar_select %p2381_p3, 1, 0 }
  0x1e   : > { %p1873_p4 = pneg %p2381_p3  ;;  %s2398_s27 = sshll.u32 %s2239_s20, 4  ;;  %s464_s27 = int_to_ptr.vmem [resolvable:$true] %s2398_s27 }
  0x1f   : > { %s2831_s6 = sld [smem:[#allocation23_spill]] }
  0x20   : > { %p2392_p6 = pnand %p1873_p4, %p2376_p1 }
  0x22   : > { %p2408_p8 = pneg %p2392_p6 }
  0x25   : > { %s2003_s15 = scalar_lea.hbm %s2831_s6, 256 }
  0x26   : > { %p2004_p7 = scmp.ne.s32.totalorder %s2831_s6, %s2003_s15  ;;  %p2010_p11 = scmp.lt.u32.totalorder %s2003_s15, %s2831_s6 }
  0x28   : > { %p2006_p9 = pnand %p2408_p8, %p2004_p7 }
  0x2a   : > { %p2007_p10 = pneg %p2006_p9 }
  0x2c   : > { %p2012_p12 = pnand %p2010_p11, %p2007_p10 }
  0x2e   : > { %2015 = shalt.err (!%p2012_p12)
}
  0x2f   : > { %s2016_s13 = scalar_lea.vmem %s2385_s0, 256  ;;  %p2024_p4 = scmp.lt.s32.totalorder %s2385_s0, %s2385_s0 }
  0x30   : > { %p2017_p13 = scmp.ne.s32.totalorder %s2385_s0, %s2016_s13  ;;  %p2025_p5 = scmp.lt.s32.totalorder %s2016_s13, %s2016_s13 }
  0x32   : > { %p2019_p0 = pnand %p2017_p13, %p2408_p8  ;;  %p2026_p7 = por %p2025_p5, %p2024_p4 }
  0x34   : > { %p2020_p2 = pneg %p2019_p0 }
  0x36   : > { %p2027_p9 = pnand %p2026_p7, %p2020_p2 }
  0x38   : > { %2030 = shalt.err (!%p2027_p9)
}
  0x39   : > { %s2240_s14 = smov 64   ;;  %s2241_s15 = smov 4  }
  0x3a   : > { %1876 = dma.hbm_to_vmem [thread:$0]  (!%p2392_p6), %s2831_s6, 256, %s2385_s0, [#allocation7], %s2240_s14, %s2240_s14, %s2241_s15  }
  0x3b   : > { %s2031_s12 = scalar_lea.hbm %s2796_s8, 16 }
  0x3c   : > { %p2032_p5 = scmp.ne.s32.totalorder %s2796_s8, %s2031_s12  ;;  %p2038_p12 = scmp.lt.u32.totalorder %s2031_s12, %s2796_s8 }
  0x3e   : > { %p2034_p10 = pnand %p2032_p5, %p2408_p8 }
  0x40   : > { %p2035_p11 = pneg %p2034_p10 }
  0x42   : > { %p2040_p13 = pnand %p2038_p12, %p2035_p11 }
  0x44   : > { %2043 = shalt.err (!%p2040_p13)
}
  0x45   : > { %s2044_s0 = scalar_lea.vmem %s2396_s19, 16  ;;  %s2051_s3 = scalar_lea.vmem %s2396_s19, 32 }
  0x46   : > { %p2045_p0 = scmp.ne.s32.totalorder %s2396_s19, %s2044_s0  ;;  %p2052_p7 = scmp.lt.s32.totalorder %s2396_s19, %s2396_s19 }
  0x47   : > { %p2053_p9 = scmp.lt.s32.totalorder %s2051_s3, %s2044_s0 }
  0x48   : > { %p2047_p2 = pnand %p2045_p0, %p2408_p8 }
  0x49   : > { %p2054_p5 = por %p2053_p9, %p2052_p7 }
  0x4a   : > { %p2048_p4 = pneg %p2047_p2 }
  0x4c   : > { %p2055_p10 = pnand %p2054_p5, %p2048_p4 }
  0x4e   : > { %2058 = shalt.err (!%p2055_p10)
}
  0x4f   : > { %1882 = dma.hbm_to_vmem [thread:$0]  (!%p2392_p6), %s2796_s8, 16, %s2396_s19, [#allocation10]  }
  0x50   : > { %s2059_s15 = scalar_lea.hbm %s2795_s7, 16 }
  0x51   : > { %p2060_p11 = scmp.ne.s32.totalorder %s2795_s7, %s2059_s15  ;;  %p2066_p0 = scmp.lt.u32.totalorder %s2059_s15, %s2795_s7 }
  0x53   : > { %p2062_p12 = pnand %p2060_p11, %p2408_p8 }
  0x55   : > { %p2063_p13 = pneg %p2062_p12 }
  0x57   : > { %p2068_p2 = pnand %p2066_p0, %p2063_p13 }
  0x59   : > { %2071 = shalt.err (!%p2068_p2)
}
  0x5a   : > { %s2072_s13 = scalar_lea.vmem %s464_s27, 16  ;;  %s2079_s19 = scalar_lea.vmem %s464_s27, 32 }
  0x5b   : > { %p2073_p4 = scmp.ne.s32.totalorder %s464_s27, %s2072_s13  ;;  %p2080_p5 = scmp.lt.s32.totalorder %s464_s27, %s464_s27 }
  0x5c   : > { %p2081_p10 = scmp.lt.s32.totalorder %s2079_s19, %s2072_s13 }
  0x5d   : > { %p2075_p7 = pnand %p2073_p4, %p2408_p8 }
  0x5e   : > { %p2082_p3 = por %p2081_p10, %p2080_p5 }
  0x5f   : > { %p2076_p9 = pneg %p2075_p7 }
  0x61   : > { %p2083_p1 = pnand %p2082_p3, %p2076_p9 }
  0x63   : > { %2086 = shalt.err (!%p2083_p1)
}
  0x64   : > { %1879 = dma.hbm_to_vmem [thread:$0]  (!%p2392_p6), %s2795_s7, 16, %s464_s27, [#allocation7]  }
  0x65   : > { %s2242_s5 = smov [#allocation11]   ;;  %s2087_s15 = scalar_lea.hbm %s2797_s9, 16 }
  0x66   : > { %s485_s10 = sshll.u32 %s2242_s5, 4  ;;  %p2088_p11 = scmp.ne.s32.totalorder %s2797_s9, %s2087_s15  ;;  %s486_s10 = int_to_ptr.vmem [resolvable:$true] %s485_s10 }
  0x67   : > { %p2094_p12 = scmp.lt.u32.totalorder %s2087_s15, %s2797_s9 }
  0x68   : > { %p2090_p1 = pnand %p2088_p11, %p2408_p8 }
  0x6a   : > { %p2091_p3 = pneg %p2090_p1 }
  0x6c   : > { %p2096_p13 = pnand %p2094_p12, %p2091_p3 }
  0x6e   : > { %2099 = shalt.err (!%p2096_p13)
}
  0x6f   : > { %s2100_s27 = scalar_lea.vmem %s486_s10, 16  ;;  %s2107_s13 = scalar_lea.vmem %s486_s10, 32 }
  0x70   : > { %p2101_p0 = scmp.ne.s32.totalorder %s486_s10, %s2100_s27  ;;  %p2108_p7 = scmp.lt.s32.totalorder %s486_s10, %s486_s10 }
  0x71   : > { %p2109_p9 = scmp.lt.s32.totalorder %s2107_s13, %s2100_s27 }
  0x72   : > { %p2103_p2 = pnand %p2101_p0, %p2408_p8 }
  0x73   : > { %p2110_p5 = por %p2109_p9, %p2108_p7 }
  0x74   : > { %p2104_p4 = pneg %p2103_p2 }
  0x76   : > { %p2111_p10 = pnand %p2110_p5, %p2104_p4 }
  0x78   : > { %2114 = shalt.err (!%p2111_p10)
}
  0x79   : > { %1885 = dma.hbm_to_vmem [thread:$0]  (!%p2392_p6), %s2797_s9, 16, %s486_s10, [#allocation10]  }
  0x7a   : > { %s1673_s11 = sadd.s32 4294967294, %s2235_s26   ;;  %s46_s3 = sadd.s32 1, %s2231_s25 }
  0x7b   : > { %p48_p8 = scmp.ge.s32.totalorder %s46_s3, 2  ;;  %s53_s17 = sadd.s32 1, %s2223_s23 }
  0x7c   : > { %p60_p11 = scmp.ne.s32.totalorder %s2223_s23, %s2219_s22  ;;  %p61_p1 = scmp.eq.s32.totalorder %s2235_s26, 0 }
  0x7d   : > { %s2864_s3 = smov (%p48_p8, %s46_s3), 0  ;;  %p66_p12 = scmp.ne.s32.totalorder %s2219_s22, %s2215_s21 }
  0x7e   : > { %p2498_p3 = por %p61_p1, %p60_p11  ;;  %s50_s10 = ssub.s32 %s2231_s25, %s2864_s3 }
  0x7f   : > { %s2834_s12 = sadd.s32 4294967295, %s2235_s26   ;;  %p51_p13 = scmp.eq.s32.totalorder %s50_s10, 0 }
  0x80   : > { %p412_p6 = scmp.eq.s32.totalorder %s2834_s12, 1  ;;  %p2835_p0 = scmp.ne.s32.totalorder %s2828_s28, 0 }
  0x81   : > { %p418_p7 = scmp.eq.s32.totalorder %s1673_s11, 1  ;;  %p1898_p5 = scmp.lt.s32.totalorder %s2235_s26, 2 }
  0x82   : > { %p2510_p2 = por %p2835_p0, %p66_p12  ;;  %p2514_p4 = por %p412_p6, %p60_p11 }
  0x83   : > { %s2519_s16 = scalar_select %p51_p13, %s2223_s23, %s53_s17  }
  0x84   : > { %s2837_s15 = scalar_select %p2514_p4, 1, 0 }
  0x85   : > { %p2521_p9 = por %p418_p7, %p66_p12  ;;  %s514_s18 = sand.u32 1, %s2223_s23  }
  0x86   : > { %s1680_s20 = sshll.u32 %s2231_s25, 4  ;;  %s2839_s19 = sld [smem:[#allocation17_spill]] }
  0x87   : > { %s2838_s30 = scalar_select %p2521_p9, 1, 0 }
  0x88   : > { %s517_s10 = scalar_lea.vmem [#allocation3], %s514_s18  ;;  %p2537_p10 = pnand %p1898_p5, %p2498_p3 }
  0x89   : > { %s524_s11 = sshll.u32 %s517_s10, 4  ;;  %s515_s12 = scalar_lea.sflag [#allocation4], %s514_s18  ;;  %s2533_s11 = int_to_ptr.vmem [resolvable:$true] %s524_s11 }
  0x8a   : > { %p2117_p11 = pneg %p2537_p10 }
  0x8c   : > { %s2531_s0 = scalar_lea.hbm %s2839_s19, %s1680_s20  ;;  %s2120_s13 = scalar_lea.hbm %s2839_s19, 32 }
  0x8d   : > { %s2115_s6 = scalar_lea.hbm %s2531_s0, 16  ;;  %p2121_p3 = scmp.lt.u32.totalorder %s2531_s0, %s2839_s19 }
  0x8e   : > { %p2116_p8 = scmp.ne.s32.totalorder %s2531_s0, %s2115_s6  ;;  %p2122_p6 = scmp.lt.u32.totalorder %s2120_s13, %s2115_s6 }
  0x8f   : > { %p2124_p0 = scmp.lt.u32.totalorder %s2115_s6, %s2531_s0 }
  0x90   : > { %p2118_p1 = pnand %p2117_p11, %p2116_p8  ;;  %p2123_p13 = por %p2122_p6, %p2121_p3 }
  0x92   : > { %p2119_p12 = pneg %p2118_p1  ;;  %p2125_p7 = por %p2124_p0, %p2123_p13 }
  0x94   : > { %p2126_p5 = pnand %p2125_p7, %p2119_p12 }
  0x96   : > { %2129 = shalt.err (!%p2126_p5)
}
  0x97   : > { %s2130_s18 = scalar_lea.vmem %s2533_s11, 16  ;;  %s2243_s20 = smov [#allocation3]  }
  0x98   : > { %p2131_p8 = scmp.ne.s32.totalorder %s2533_s11, %s2130_s18  ;;  %s2135_s27 = sshll.u32 %s2243_s20, 4  ;;  %s2136_s27 = int_to_ptr.vmem [resolvable:$false] %s2135_s27 }
  0x99   : > { %s2137_s5 = scalar_lea.vmem %s2136_s27, 32  ;;  %p2138_p4 = scmp.lt.s32.totalorder %s2533_s11, %s2136_s27 }
  0x9a   : > { %p2133_p1 = pnand %p2131_p8, %p2117_p11  ;;  %p2139_p3 = scmp.lt.s32.totalorder %s2137_s5, %s2130_s18 }
  0x9c   : > { %p2134_p9 = pneg %p2133_p1  ;;  %p2140_p6 = por %p2139_p3, %p2138_p4 }
  0x9e   : > { %p2141_p13 = pnand %p2140_p6, %p2134_p9 }
  0xa0   : > { %2144 = shalt.err (!%p2141_p13)
}
  0xa1   : > { %1889 = dma.hbm_to_vmem [thread:$0]  (!%p2537_p10), %s2531_s0, 16, %s2533_s11, %s515_s12  }
  0xa2   : > { %p2841_p12 = scmp.ne.s32.totalorder %s2829_s29, 0 }
  0xa3   : > { %s2569_s6 = sand.u32 (!%p2841_p12), 1, %s2219_s22  }
  0xa4   : > { %540 = sbr.rel (%p2841_p12) target bundleno = 2718 (0xa9e), region = 84  ;;  %s543_s13 = scalar_lea.sflag (!%p2841_p12), [#allocation4], %s2569_s6 }
  0xa5   : > { %s545_s10 = scalar_lea.vmem (!%p2841_p12), [#allocation3], %s2569_s6 }
  0xab   : > { %2198 = dma.done.wait (%p2510_p2), %s543_s13, 16  }
  0xac   : > { %2200 = vsyncadd (%p2510_p2), %s543_s13, 4294967280  ;;  %p2842_p4 = scmp.ne.s32.totalorder %s2828_s28, 0 }
  0xae   : > { %2202 = dma.done.wait (%p2842_p4), [#allocation7], 272  }
  0xaf   : > { %2204 = vsyncadd (%p2842_p4), [#allocation7], 4294967024 }
  0xb0   : > { %2206 = dma.done.wait (%p2842_p4), [#allocation10], 32  }
  0xb1   : > { %2208 = vsyncadd (%p2842_p4), [#allocation10], 4294967264  ;;  %p613_p9 = scmp.lt.s32.totalorder %s2227_s24, 1  ;;  %v2244_v0 = vmov 0.0   ;;  %vm2245_vm0 = vmmov 0   ;;  %s2843_s1 = sld [smem:[#allocation18_spill]] }
  0xb2   : > { %1761 = vmatprep.subr.bf16.mxu1 %v2244_v0  ;;  %1765 = vmatprep.mubr.msk.bf16.mxu1 %vm2245_vm0, %v2244_v0  ;;  %s2844_s4 = sld [smem:[#allocation21_spill]]  ;;  %vm647_vm1 = vcmask 261120   ;;  %s2845_s2 = sld [smem:[#allocation19_spill]]  ;;  %vm692_vm2 = vcmask 519168   ;;  %vm774_vm3 = vcmask 64512   ;;  %vm844_vm4 = vcmask 1043456  }
  0xb3   : > { %s614_s29 = scalar_select %p613_p9, %s2227_s24, 1  ;;  %1777 = vmatprep.subr.bf16.mxu0 %v2244_v0  ;;  %1779 = vmatprep.mubr.msk.bf16.mxu0 %vm2245_vm0, %v2244_v0  ;;  %v1696_v33 = vld [vmem:[%s545_s10] ss:$0 sm:$0xff]  ;;  %vm1244_vm5 = vcmask 130048   ;;  %vm1247_vm6 = vcmask 195584   ;;  %vm1454_vm7 = vcmask 523264  }
  0xb4   : > { %s2846_s28 = sld [smem:[#allocation22_spill]]  ;;  %s2847_s12 = sld [smem:[#allocation20_spill]] }
  0xb5   : > { %s1687_s14 = sshll.u32 %s614_s29, 3  ;;  %s2246_s18 = smov 112  }
  0xb6   : > { %s2247_s20 = smov 120   ;;  %s2248_s27 = smov 104  }
  0xb7   : > { %s616_s11 = scalar_lea.vmem %s2843_s1, %s1687_s14  ;;  %s2249_s10 = smov 96  }
  0xb8   : > { %v1970_v1 = vld [vmem:[%s2844_s4] sm:$0xff]   ;;  %v1971_v2 = vld [vmem:[%s2844_s4 + $0x8] sm:$0xff]   ;;  %s2250_s5 = smov 80   ;;  %s2251_s13 = smov 72  }
  0xb9   : > { %1762 = vmatpush3.bf16.msra.mxu1 %v1970_v1  ;;  %v2602_v3 = vld [vmem:[%s616_s11] sm:$0xff]  ;;  %v1973_v6 = vld [vmem:[%s2845_s2 + $0x8] sm:$0xff]   ;;  %s2252_s29 = smov 88   ;;  %s2253_s14 = smov 8  }
  0xba   : > { %1763 = vmatprep.subr.bf16.mxu1 %v2244_v0  ;;  %v1972_v4 = vld [vmem:[%s2845_s2] sm:$0xff]   ;;  %v623_v5 = vpack.c.bf16 %v2602_v3, %v2602_v3  ;;  %s2254_s0 = smov 16   ;;  %s2854_s2 = sld [smem:[#allocation30_spill]] }
  0xbb   : > { %v1688_v7 = vld [vmem:[%s2846_s28] ss:$0 sm:$0xff]  ;;  %s2255_s28 = smov 24   ;;  %p2855_p10 = scmp.ne.s32.totalorder %s2837_s15, 0 }
  0xbc   : > { %v1692_v14 = vld [vmem:[%s2847_s12] ss:$0 sm:$0xff]  ;;  %s2848_s12 = sld [smem:[#allocation24_spill]] }
  0xbd   : > { %1764 = vmatpush3.bf16.msra.mxu1 %v1971_v2 }
  0xbe   : > { %1769 = vmatprep.subr.bf16.mxu1 %v2244_v0 }
  0xc0   : > { %1766 = vmatmul.mubr.msk.bf16.vlgmr.msra.gmra.mrb[0].mxu1 %vm647_vm1, %v623_v5 }
  0xc1   : > { %1770 = vmatpush3.bf16.msra.mxu1 %v1972_v4  ;;  %1773 = vmatprep.mubr.msk.bf16.mxu1 %vm2245_vm0, %v2244_v0 }
  0xc2   : > { %1771 = vmatprep.subr.bf16.mxu1 %v2244_v0 }
  0xc5   : > { %1772 = vmatpush3.bf16.msra.mxu1 %v1973_v6 }
  0xc6   : > { %1783 = vmatprep.subr.bf16.mxu1 %v2244_v0 }
  0xc8   : > { %1774 = vmatmul.mubr.msk.bf16.vlgmr.msra.gmra.mrb[4].mxu1 %vm647_vm1, %v623_v5 }
  0xc9   : > { %1785 = vmatprep.mubr.msk.bf16.mxu1 %vm2245_vm0, %v2244_v0 }
 0x193   : > { %v685_v8 = vpop.f32.mrb[0].mxu1 }
 0x194   : > { %v686_v9 = vadd.f32 %v1688_v7, %v685_v8  ;;  %v1767_v10 = vpop.f32.mrb[1].mxu1 }
 0x195   : > { %v688_v11 = vpop.f32.mrb[2].mxu1 }
 0x196   : > { %v691_v12 = vpack.c.bf16 %v686_v9, %v686_v9  ;;  %v1768_v13 = vpop.f32.mrb[3].mxu1 }
 0x198   : > { %693 = vst.msk [vmem:[#allocation2] sm:$0xf] %vm692_vm2, %v691_v12 }
 0x19b   : > { %v760_v15 = vpop.f32.mrb[4].mxu1 }
 0x19c   : > { %v1775_v16 = vpop.f32.mrb[5].mxu1  ;;  %v761_v18 = vadd.f32 %v1692_v14, %v760_v15 }
 0x19d   : > { %v763_v17 = vpop.f32.mrb[6].mxu1 }
 0x19e   : > { %v1776_v19 = vpop.f32.mrb[7].mxu1  ;;  %v766_v23 = vpack.c.bf16 %v761_v18, %v761_v18 }
 0x19f   : > { %v767_v20 = vld [vmem:[#allocation2] sm:$0xf] }
 0x1a0   : > { %v779_v21 = vsel %vm774_vm3, %v767_v20, 0  ;;  %v2629_v22 = vcombine.low %v767_v20, %v767_v20 }
 0x1a1   : > { %1778 = vmatpush3.bf16.xpose.msra.mxu0 %v779_v21 }
 0x1a2   : > { %1006 = vrot.lane.b32.xlu1 %v2629_v22, %s2246_s18  ;;  %892 = vrot.lane.b32.xlu0 %v2629_v22, %s2247_s20 }
 0x1a3   : > { %1789 = vmatprep.subr.bf16.mxu0 %v2244_v0 }
 0x1a6   : > { %1004 = vrot.lane.b32.xlu1 %v766_v23, %s2246_s18  ;;  %890 = vrot.lane.b32.xlu0 %v766_v23, %s2247_s20  ;;  %s2850_s20 = sld [smem:[#allocation25_spill]]  ;;  %s2853_s18 = sld [smem:[#allocation29_spill]] }
 0x1a8   : > { %1780 = vmatmul.mubr.msk.bf16.vlgmr.msra.gmra.mrb[0].mxu0 %vm774_vm3, %v766_v23 }
 0x1a9   : > { %1791 = vmatprep.mubr.msk.bf16.mxu0 %vm2245_vm0, %v2244_v0 }
 0x1aa   : > { %1118 = vrot.lane.b32.xlu1 %v766_v23, %s2248_s27  ;;  %1120 = vrot.lane.b32.xlu0 %v2629_v22, %s2248_s27 }
 0x214   : > { %v893_v24 = vpop.permute.xlu0 %892  ;;  %v1007_v26 = vpop.permute.xlu1 %1006 }
 0x215   : > { %v898_v25 = vsel %vm774_vm3, %v893_v24, 0  ;;  %v1012_v28 = vsel %vm774_vm3, %v1007_v26, 0 }
 0x216   : > { %1790 = vmatpush3.bf16.xpose.msra.mxu0 %v898_v25 }
 0x217   : > { %1801 = vmatprep.subr.bf16.mxu0 %v2244_v0 }
 0x218   : > { %v891_v27 = vpop.permute.xlu0 %890  ;;  %v1005_v30 = vpop.permute.xlu1 %1004 }
 0x21c   : > { %v1121_v29 = vpop.permute.xlu0 %1120  ;;  %v1119_v32 = vpop.permute.xlu1 %1118 }
 0x21d   : > { %1792 = vmatmul.mubr.msk.bf16.vlgmr.msra.gmra.mrb[4].mxu0 %vm774_vm3, %v891_v27  ;;  %v1126_v31 = vsel %vm774_vm3, %v1121_v29, 0 }
 0x21e   : > { %1802 = vmatpush3.bf16.xpose.msra.mxu0 %v1012_v28  ;;  %1803 = vmatprep.mubr.msk.bf16.mxu0 %vm2245_vm0, %v2244_v0 }
 0x21f   : > { %1813 = vmatprep.subr.bf16.mxu0 %v2244_v0 }
 0x225   : > { %1804 = vmatmul.mubr.msk.bf16.vlgmr.msra.gmra.mrb[8].mxu0 %vm774_vm3, %v1005_v30 }
 0x226   : > { %1814 = vmatpush3.bf16.xpose.msra.mxu0 %v1126_v31  ;;  %1815 = vmatprep.mubr.msk.bf16.mxu0 %vm2245_vm0, %v2244_v0 }
 0x227   : > { %1825 = vmatprep.subr.bf16.mxu0 %v2244_v0 }
 0x22d   : > { %1816 = vmatmul.mubr.msk.bf16.vlgmr.msra.gmra.mrb[12].mxu0 %vm774_vm3, %v1119_v32 }
 0x22e   : > { %1829 = vmatprep.mubr.msk.bf16.mxu0 %vm2245_vm0, %v2244_v0 }
 0x27b   : > { %v815_v34 = vpop.f32.mrb[0].mxu0 }
 0x27c   : > { %v816_v35 = vadd.f32 %v1696_v33, %v815_v34  ;;  %v1781_v36 = vpop.f32.mrb[1].mxu0 }
 0x27d   : > { %v818_v37 = vpop.f32.mrb[2].mxu0 }
 0x27e   : > { %v1782_v38 = vpop.f32.mrb[3].mxu0  ;;  %v821_v39 = vsel %vm774_vm3, %v816_v35, -inf }
 0x27f   : > { %822 = vmax.xlane.f32.xlu0 %v821_v39 }
 0x2f0   : > { %v934_v40 = vpop.f32.mrb[4].mxu0 }
 0x2f1   : > { %v935_v41 = vadd.f32 %v1696_v33, %v934_v40  ;;  %v1793_v42 = vpop.f32.mrb[5].mxu0 }
 0x2f2   : > { %v937_v43 = vpop.f32.mrb[6].mxu0 }
 0x2f3   : > { %v1794_v44 = vpop.f32.mrb[7].mxu0  ;;  %v940_v45 = vsel %vm774_vm3, %v935_v41, -inf }
 0x2f4   : > { %941 = vmax.xlane.f32.xlu1 %v940_v45 }
 0x2f8   : > { %v1048_v46 = vpop.f32.mrb[8].mxu0 }
 0x2f9   : > { %v1049_v47 = vadd.f32 %v1696_v33, %v1048_v46  ;;  %v1805_v48 = vpop.f32.mrb[9].mxu0 }
 0x2fa   : > { %v1051_v49 = vpop.f32.mrb[10].mxu0 }
 0x2fb   : > { %v1806_v50 = vpop.f32.mrb[11].mxu0  ;;  %v1054_v51 = vsel %vm774_vm3, %v1049_v47, -inf }
 0x2fc   : > { %1055 = vmax.xlane.f32.xlu0 %v1054_v51 }
 0x300   : > { %v1162_v52 = vpop.f32.mrb[12].mxu0 }
 0x301   : > { %v1163_v53 = vadd.f32 %v1696_v33, %v1162_v52  ;;  %v1817_v54 = vpop.f32.mrb[13].mxu0 }
 0x302   : > { %v1165_v55 = vpop.f32.mrb[14].mxu0 }
 0x303   : > { %v1818_v56 = vpop.f32.mrb[15].mxu0  ;;  %v1168_v57 = vsel %vm774_vm3, %v1163_v53, -inf }
 0x304   : > { %1169 = vmax.xlane.f32.xlu0 %v1168_v57  ;;  %v1975_v56 = vld [vmem:[#allocation6] sm:$0xff]  }
 0x305   : > { %1826 = vmatpush3.bf16.msra.mxu0 %v1975_v56 }
 0x306   : > { %1827 = vmatprep.subr.bf16.mxu0 %v2244_v0 }
 0x30c   : > { %v823_v58 = vpop.xlane.xlu0 %822 }
 0x30d   : > { %v824_v59 = vsub.f32 %v816_v35, %v823_v58  ;;  %v1976_v58 = vld [vmem:[#allocation6 + $0x8] sm:$0xff]  }
 0x30e   : > { %1828 = vmatpush3.bf16.msra.mxu0 %v1976_v58 }
 0x30f   : > { %v825_v60 = vmul.f32 1.442695, %v824_v59  ;;  %1841 = vmatprep.subr.bf16.mxu0 %v2244_v0 }
 0x311   : > { %1983 = vpow2.f32 %v825_v60 }
 0x31b   : > { %v1984_v61 = vpop.eup %1983 }
 0x31c   : > { %v827_v62 = vsel %vm774_vm3, %v1984_v61, 0.0 }
 0x31d   : > { %828 = vadd.xlane.f32.xlu1 %v827_v62 }
 0x32e   : > { %839 = vrot.lane.b32.xlu1 %v2629_v22, %s2249_s10 }
 0x381   : > { %v942_v63 = vpop.xlane.xlu1 %941 }
 0x382   : > { %v943_v1 = vsub.f32 %v935_v41, %v942_v63 }
 0x384   : > { %v944_v2 = vmul.f32 1.442695, %v943_v1 }
 0x386   : > { %1985 = vpow2.f32 %v944_v2 }
 0x389   : > { %v1056_v4 = vpop.xlane.xlu0 %1055 }
 0x38a   : > { %v1057_v5 = vsub.f32 %v1049_v47, %v1056_v4 }
 0x38c   : > { %v1058_v6 = vmul.f32 1.442695, %v1057_v5 }
 0x38e   : > { %1987 = vpow2.f32 %v1058_v6 }
 0x390   : > { %v1986_v7 = vpop.eup %1985 }
 0x391   : > { %v1170_v8 = vpop.xlane.xlu0 %1169  ;;  %v946_v9 = vsel %vm774_vm3, %v1986_v7, 0.0 }
 0x392   : > { %v1171_v10 = vsub.f32 %v1163_v53, %v1170_v8  ;;  %947 = vadd.xlane.f32.xlu0 %v946_v9 }
 0x394   : > { %v1172_v11 = vmul.f32 1.442695, %v1171_v10 }
 0x396   : > { %1989 = vpow2.f32 %v1172_v11 }
 0x398   : > { %v1988_v12 = vpop.eup %1987 }
 0x399   : > { %v1060_v13 = vsel %vm774_vm3, %v1988_v12, 0.0 }
 0x39a   : > { %1061 = vadd.xlane.f32.xlu1 %v1060_v13 }
 0x3a0   : > { %v1990_v14 = vpop.eup %1989 }
 0x3a1   : > { %v1174_v15 = vsel %vm774_vm3, %v1990_v14, 0.0 }
 0x3a2   : > { %1175 = vadd.xlane.f32.xlu0 %v1174_v15 }
 0x3aa   : > { %v829_v16 = vpop.xlane.xlu1 %828 }
 0x3ab   : > { %1991 = vrcp.f32 %v829_v16  ;;  %1069 = vrot.lane.b32.xlu1 %v2629_v22, %s2250_s5  ;;  %s2849_s5 = sld [smem:[#allocation26_spill]] }
 0x3ae   : > { %v840_v17 = vpop.permute.xlu1 %839 }
 0x3af   : > { %v846_v18 = vsel %vm844_vm4, %v840_v17, 0  ;;  %1183 = vrot.lane.b32.xlu1 %v2629_v22, %s2251_s13  ;;  %s2851_s13 = sld [smem:[#allocation27_spill]] }
 0x3b0   : > { %1784 = vmatpush3.bf16.msra.mxu1 %v846_v18  ;;  %v1706_v18 = vld [vmem:[#allocation8] ss:$0 sm:$0xff] }
 0x3b1   : > { %1795 = vmatprep.subr.bf16.mxu1 %v2244_v0 }
 0x3b5   : > { %v1992_v19 = vpop.eup %1991 }
 0x3b6   : > { %v831_v20 = vmul.f32 %v1992_v19, %v829_v16 }
 0x3b8   : > { %v832_v21 = vsub.f32 2.0, %v831_v20  ;;  %955 = vrot.lane.b32.xlu0 %v2629_v22, %s2252_s29  ;;  %s1686_s29 = sshll.u32 %s2569_s6, 3 }
 0x3b9   : > { %s612_s27 = scalar_lea.vmem [#allocation12], %s1686_s29 }
 0x3ba   : > { %v833_v23 = vmul.f32 %v1992_v19, %v832_v21  ;;  %s1544_s10 = sshll.u32 %s612_s27, 4  ;;  %s2740_s10 = int_to_ptr.vmem [resolvable:$true] %s1544_s10 }
 0x3bc   : > { %v834_v24 = vmul.f32 %v1984_v61, %v833_v23 }
 0x3be   : > { %v835_v25 = vpack.c.bf16 %v834_v24, %v834_v24 }
 0x3c0   : > { %1786 = vmatmul.mubr.msk.bf16.vlgmr.msra.gmra.mrb[8].mxu1 %vm774_vm3, %v835_v25 }
 0x3c1   : > { %1797 = vmatprep.mubr.msk.bf16.mxu1 %vm2245_vm0, %v2244_v0 }
 0x41f   : > { %v948_v26 = vpop.xlane.xlu0 %947 }
 0x420   : > { %1993 = vrcp.f32 %v948_v26 }
 0x427   : > { %v1062_v27 = vpop.xlane.xlu1 %1061 }
 0x428   : > { %1995 = vrcp.f32 %v1062_v27 }
 0x42a   : > { %v1994_v28 = vpop.eup %1993 }
 0x42b   : > { %v950_v29 = vmul.f32 %v1994_v28, %v948_v26  ;;  %v1070_v38 = vpop.permute.xlu1 %1069 }
 0x42c   : > { %v1075_v41 = vsel %vm844_vm4, %v1070_v38, 0  ;;  %v1710_v38 = vld [vmem:[#allocation9] ss:$0 sm:$0xff] }
 0x42d   : > { %v951_v30 = vsub.f32 2.0, %v950_v29 }
 0x42f   : > { %v952_v31 = vmul.f32 %v1994_v28, %v951_v30  ;;  %v1176_v32 = vpop.xlane.xlu0 %1175  ;;  %v1184_v45 = vpop.permute.xlu1 %1183 }
 0x430   : > { %1997 = vrcp.f32 %v1176_v32  ;;  %v1189_v49 = vsel %vm844_vm4, %v1184_v45, 0  ;;  %v1982_v45 = vld [vmem:[%s2849_s5 + $0x18] sm:$0xff]  }
 0x431   : > { %v953_v22 = vmul.f32 %v1986_v7, %v952_v31 }
 0x432   : > { %v1996_v33 = vpop.eup %1995 }
 0x433   : > { %v1064_v34 = vmul.f32 %v1996_v33, %v1062_v27  ;;  %v956_v35 = vpop.permute.xlu0 %955  ;;  %v954_v39 = vpack.c.bf16 %v953_v22, %v953_v22  ;;  %v1980_v22 = vld [vmem:[%s2849_s5 + $0x8] sm:$0xff]  }
 0x434   : > { %v961_v36 = vsel %vm844_vm4, %v956_v35, 0 }
 0x435   : > { %v1065_v37 = vsub.f32 2.0, %v1064_v34  ;;  %1796 = vmatpush3.bf16.msra.mxu1 %v961_v36 }
 0x436   : > { %1807 = vmatprep.subr.bf16.mxu1 %v2244_v0 }
 0x437   : > { %v1066_v40 = vmul.f32 %v1996_v33, %v1065_v37  ;;  %v1978_v33 = vld [vmem:[%s2848_s12 + $0x8] sm:$0xff]  }
 0x438   : > { %1798 = vmatmul.mubr.msk.bf16.vlgmr.msra.gmra.mrb[12].mxu1 %vm774_vm3, %v954_v39 }
 0x439   : > { %1808 = vmatpush3.bf16.msra.mxu1 %v1075_v41  ;;  %1809 = vmatprep.mubr.msk.bf16.mxu1 %vm2245_vm0, %v2244_v0  ;;  %v1067_v43 = vmul.f32 %v1988_v12, %v1066_v40  ;;  %v1711_v40 = vld [vmem:[#allocation11] ss:$0 sm:$0xff] }
 0x43a   : > { %v1998_v42 = vpop.eup %1997  ;;  %1819 = vmatprep.subr.bf16.mxu1 %v2244_v0 }
 0x43b   : > { %v1178_v44 = vmul.f32 %v1998_v42, %v1176_v32  ;;  %v1068_v47 = vpack.c.bf16 %v1067_v43, %v1067_v43  ;;  %v1977_v32 = vld [vmem:[%s2848_s12] sm:$0xff]  }
 0x43d   : > { %v1179_v46 = vsub.f32 2.0, %v1178_v44  ;;  %v1981_v44 = vld [vmem:[%s2849_s5 + $0x10] sm:$0xff]  }
 0x43f   : > { %v1180_v48 = vmul.f32 %v1998_v42, %v1179_v46  ;;  %v1712_v46 = vld [vmem:[%s2850_s20] ss:$0 sm:$0xff]  ;;  %s1725_s20 = sshll.u32 %s2227_s24, 7  ;;  %s2256_s24 = smov [#allocation12]  }
 0x440   : > { %1810 = vmatmul.mubr.msk.bf16.vlgmr.msra.gmra.mrb[16].mxu1 %vm774_vm3, %v1068_v47  ;;  %s2738_s4 = scalar_lea.hbm %s2854_s2, %s1725_s20  ;;  %s2149_s29 = sshll.u32 %s2256_s24, 4  ;;  %s2150_s29 = int_to_ptr.vmem [resolvable:$false] %s2149_s29 }
 0x441   : > { %1820 = vmatpush3.bf16.msra.mxu1 %v1189_v49  ;;  %1821 = vmatprep.mubr.msk.bf16.mxu1 %vm2245_vm0, %v2244_v0  ;;  %v1181_v50 = vmul.f32 %v1990_v14, %v1180_v48  ;;  %p2152_p7 = scmp.lt.s32.totalorder %s2740_s10, %s2150_s29 }
 0x442   : > { %1833 = vmatprep.subr.bf16.mxu1 %v2244_v0 }
 0x443   : > { %v1182_v51 = vpack.c.bf16 %v1181_v50, %v1181_v50 }
 0x448   : > { %1822 = vmatmul.mubr.msk.bf16.vlgmr.msra.gmra.mrb[20].mxu1 %vm774_vm3, %v1182_v51 }
 0x449   : > { %1837 = vmatprep.mubr.msk.bf16.mxu1 %vm2245_vm0, %v2244_v0  ;;  %1834 = vmatpush3.bf16.msra.mxu1 %v1977_v32 }
 0x44a   : > { %1835 = vmatprep.subr.bf16.mxu1 %v2244_v0 }
 0x44d   : > { %1836 = vmatpush3.bf16.msra.mxu1 %v1978_v33 }
 0x493   : > { %v882_v52 = vpop.f32.mrb[8].mxu1 }
 0x494   : > { %v1787_v53 = vpop.f32.mrb[9].mxu1  ;;  %v888_v12 = vpack.c.bf16 %v882_v52, %v882_v52 }
 0x495   : > { %v885_v54 = vpop.f32.mrb[10].mxu1 }
 0x496   : > { %v1788_v55 = vpop.f32.mrb[11].mxu1 }
 0x50b   : > { %v997_v57 = vpop.f32.mrb[12].mxu1 }
 0x50c   : > { %v1003_v59 = vpack.c.bf16 %v997_v57, %v997_v57  ;;  %v1799_v60 = vpop.f32.mrb[13].mxu1 }
 0x50d   : > { %v1000_v61 = vpop.f32.mrb[14].mxu1 }
 0x50e   : > { %1233 = vrot.lane.b32.xlu0 %v1003_v59, %s2253_s14  ;;  %v1800_v62 = vpop.f32.mrb[15].mxu1  ;;  %s1530_s14 = scalar_lea.sflag [#allocation5], %s2569_s6 }
 0x513   : > { %v1111_v63 = vpop.f32.mrb[16].mxu1 }
 0x514   : > { %v1117_v1 = vpack.c.bf16 %v1111_v63, %v1111_v63  ;;  %v1811_v2 = vpop.f32.mrb[17].mxu1 }
 0x515   : > { %v1114_v4 = vpop.f32.mrb[18].mxu1 }
 0x516   : > { %1236 = vrot.lane.b32.xlu1 %v1117_v1, %s2254_s0  ;;  %v1812_v5 = vpop.f32.mrb[19].mxu1  ;;  %s2145_s0 = scalar_lea.vmem %s2740_s10, 128 }
 0x517   : > { %p2146_p2 = scmp.ne.s32.totalorder %s2740_s10, %s2145_s0 }
 0x519   : > { %p2147_p11 = pnand %p2146_p2, %p2855_p10 }
 0x51b   : > { %v1225_v6 = vpop.f32.mrb[20].mxu1  ;;  %p2148_p0 = pneg %p2147_p11 }
 0x51c   : > { %v1231_v7 = vpack.c.bf16 %v1225_v6, %v1225_v6  ;;  %v1823_v8 = vpop.f32.mrb[21].mxu1 }
 0x51d   : > { %v1228_v9 = vpop.f32.mrb[22].mxu1 }
 0x51e   : > { %1239 = vrot.lane.b32.xlu0 %v1231_v7, %s2255_s28  ;;  %v1824_v10 = vpop.f32.mrb[23].mxu1  ;;  %s2852_s28 = sld [smem:[#allocation28_spill]] }
 0x51f   : > { %v1723_v10 = vld [vmem:[%s2853_s18] ss:$0 sm:$0xff] }
 0x524   : > { %v1722_v8 = vld [vmem:[%s2852_s28] ss:$0 sm:$0xff]  ;;  %s2151_s28 = scalar_lea.vmem %s2150_s29, 256 }
 0x525   : > { %p2153_p5 = scmp.lt.s32.totalorder %s2151_s28, %s2145_s0 }
 0x527   : > { %p2154_p8 = por %p2153_p5, %p2152_p7 }
 0x529   : > { %p2155_p1 = pnand %p2154_p8, %p2148_p0 }
 0x580   : > { %v1234_v11 = vpop.permute.xlu0 %1233 }
 0x581   : > { %v1243_v14 = vsel %vm774_vm3, %v888_v12, %v1234_v11 }
 0x588   : > { %v1237_v13 = vpop.permute.xlu1 %1236 }
 0x589   : > { %v1246_v15 = vsel %vm1244_vm5, %v1243_v14, %v1237_v13 }
 0x590   : > { %v1240_v16 = vpop.permute.xlu0 %1239 }
 0x591   : > { %v1249_v17 = vsel %vm1247_vm6, %v1246_v15, %v1240_v16 }
 0x592   : > { %1830 = vmatmul.mubr.msk.bf16.vlgmr.msra.gmra.mrb[16].mxu0 %vm647_vm1, %v1249_v17 }
 0x593   : > { %1849 = vmatprep.mubr.msk.bf16.mxu0 %vm2245_vm0, %v2244_v0 }
 0x665   : > { %v1309_v19 = vpop.f32.mrb[16].mxu0 }
 0x666   : > { %v1310_v20 = vadd.f32 %v1706_v18, %v1309_v19  ;;  %v1831_v21 = vpop.f32.mrb[17].mxu0 }
 0x667   : > { %v1312_v23 = vpop.f32.mrb[18].mxu0 }
 0x668   : > { %v1832_v24 = vpop.f32.mrb[19].mxu0  ;;  %v1315_v25 = vadd.f32 %v1310_v20, %v2602_v3  ;;  %v1979_v3 = vld [vmem:[%s2849_s5] sm:$0xff]  }
 0x669   : > { %1842 = vmatpush3.bf16.msra.mxu0 %v1979_v3 }
 0x66a   : > { %v1318_v26 = vsel %vm647_vm1, %v1315_v25, 0.0  ;;  %1843 = vmatprep.subr.bf16.mxu0 %v2244_v0 }
 0x66b   : > { %1319 = vadd.xlane.f32.xlu1 %v1318_v26 }
 0x66d   : > { %1844 = vmatpush3.bf16.msra.mxu0 %v1980_v22 }
 0x66e   : > { %1845 = vmatprep.subr.bf16.mxu0 %v2244_v0 }
 0x671   : > { %1846 = vmatpush3.bf16.msra.mxu0 %v1981_v44 }
 0x672   : > { %1847 = vmatprep.subr.bf16.mxu0 %v2244_v0  ;;  %v1716_v0 = vld [vmem:[%s2851_s13] ss:$0 sm:$0xff] }
 0x675   : > { %1848 = vmatpush3.bf16.msra.mxu0 %v1982_v45 }
 0x6f8   : > { %v1320_v27 = vpop.xlane.xlu1 %1319 }
 0x6f9   : > { %v1322_v28 = vmul.f32 0.03125, %v1320_v27 }
 0x6fb   : > { %v1323_v29 = vsub.f32 %v1315_v25, %v1322_v28 }
 0x6fd   : > { %v1324_v30 = vmul.f32 %v1323_v29, %v1323_v29 }
 0x6ff   : > { %v1325_v31 = vsel %vm647_vm1, %v1324_v30, 0.0 }
 0x700   : > { %1326 = vadd.xlane.f32.xlu0 %v1325_v31 }
 0x78d   : > { %v1327_v34 = vpop.xlane.xlu0 %1326 }
 0x78e   : > { %v1328_v35 = vmul.f32 0.03125, %v1327_v34 }
 0x790   : > { %v1329_v36 = vadd.f32 1e-05, %v1328_v35 }
 0x792   : > { %1999 = vrsqrt.f32 %v1329_v36 }
 0x79c   : > { %v2000_v37 = vpop.eup %1999 }
 0x79d   : > { %v1331_v39 = vmul.f32 %v2000_v37, %v1323_v29 }
 0x79f   : > { %v1338_v41 = vmul.f32 %v1710_v38, %v1331_v39 }
 0x7a1   : > { %v1345_v42 = vadd.f32 %v1711_v40, %v1338_v41 }
 0x7a3   : > { %v1346_v43 = vpack.c.bf16 %v1345_v42, %v1345_v42 }
 0x7a5   : > { %1838 = vmatmul.mubr.msk.bf16.vlgmr.msra.gmra.mrb[24].mxu1 %vm647_vm1, %v1346_v43 }
 0x878   : > { %v1407_v47 = vpop.f32.mrb[24].mxu1 }
 0x879   : > { %v1408_v48 = vadd.f32 %v1712_v46, %v1407_v47  ;;  %v1839_v49 = vpop.f32.mrb[25].mxu1 }
 0x87a   : > { %v1410_v50 = vpop.f32.mrb[26].mxu1 }
 0x87b   : > { %v1413_v51 = vmax.f32 %v1408_v48, 0.0  ;;  %v1840_v52 = vpop.f32.mrb[27].mxu1 }
 0x87d   : > { %v1414_v53 = vpack.c.bf16 %v1413_v51, %v1413_v51 }
 0x87f   : > { %1850 = vmatmul.mubr.msk.bf16.vlgmr.msra.gmra.mrb[20].mxu0 %vm1454_vm7, %v1414_v53 }
 0x952   : > { %v1492_v54 = vpop.f32.mrb[20].mxu0 }
 0x953   : > { %v1493_v55 = vadd.f32 %v1716_v0, %v1492_v54  ;;  %v1851_v56 = vpop.f32.mrb[21].mxu0 }
 0x954   : > { %v1495_v57 = vpop.f32.mrb[22].mxu0 }
 0x955   : > { %v1852_v58 = vpop.f32.mrb[23].mxu0  ;;  %v1498_v59 = vadd.f32 %v1493_v55, %v1345_v42 }
 0x957   : > { %v1501_v60 = vsel %vm647_vm1, %v1498_v59, 0.0 }
 0x958   : > { %1502 = vadd.xlane.f32.xlu0 %v1501_v60 }
 0x9e5   : > { %v1503_v61 = vpop.xlane.xlu0 %1502 }
 0x9e6   : > { %v1504_v62 = vmul.f32 0.03125, %v1503_v61 }
 0x9e8   : > { %v1505_v63 = vsub.f32 %v1498_v59, %v1504_v62 }
 0x9ea   : > { %v1506_v1 = vmul.f32 %v1505_v63, %v1505_v63 }
 0x9ec   : > { %v1507_v2 = vsel %vm647_vm1, %v1506_v1, 0.0 }
 0x9ed   : > { %1508 = vadd.xlane.f32.xlu1 %v1507_v2 }
 0xa7a   : > { %v1509_v4 = vpop.xlane.xlu1 %1508 }
 0xa7b   : > { %v1510_v5 = vmul.f32 0.03125, %v1509_v4 }
 0xa7d   : > { %v1511_v6 = vadd.f32 1e-05, %v1510_v5 }
 0xa7f   : > { %2001 = vrsqrt.f32 %v1511_v6 }
 0xa89   : > { %v2002_v7 = vpop.eup %2001 }
 0xa8a   : > { %v1513_v9 = vmul.f32 %v2002_v7, %v1505_v63 }
 0xa8c   : > { %v1520_v11 = vmul.f32 %v1722_v8, %v1513_v9 }
 0xa8e   : > { %v1527_v12 = vadd.f32 %v1723_v10, %v1520_v11 }
 0xa90   : > { %1528 = vst.msk [vmem:[%s612_s27] sm:$0xff] %vm647_vm1, %v1527_v12 }
 0xa91   : > { %2158 = shalt.err (!%p2155_p1)
}
 0xa92   : > { %s2159_s1 = scalar_lea.hbm %s2738_s4, 128  ;;  %s2163_s17 = scalar_lea.hbm %s2854_s2, 256 }
 0xa93   : > { %p2160_p3 = scmp.ne.s32.totalorder %s2738_s4, %s2159_s1  ;;  %p2164_p12 = scmp.lt.u32.totalorder %s2738_s4, %s2854_s2 }
 0xa94   : > { %p2165_p4 = scmp.lt.u32.totalorder %s2163_s17, %s2159_s1  ;;  %p2167_p2 = scmp.lt.u32.totalorder %s2159_s1, %s2738_s4 }
 0xa95   : > { %p2161_p6 = pnand %p2160_p3, %p2855_p10 }
 0xa96   : > { %p2166_p9 = por %p2165_p4, %p2164_p12 }
 0xa97   : > { %p2162_p13 = pneg %p2161_p6 }
 0xa98   : > { %p2168_p11 = por %p2167_p2, %p2166_p9 }
 0xa9a   : > { %p2169_p0 = pnand %p2168_p11, %p2162_p13 }
 0xa9c   : > { %2172 = shalt.err (!%p2169_p0)
}
 0xa9d   : > { %1871 = dma.vmem_to_hbm [thread:$0]  (%p2855_p10), %s2740_s10, 128, %s2738_s4, %s1530_s14  }
 0xa9e PF: > { %s1556_s27 = sand.u32 1, %s2215_s21   ;;  %p2856_p7 = scmp.ne.s32.totalorder %s2838_s30, 0 }
 0xa9f   : > { %p2857_p5 = scmp.ge.s32.totalorder %s2235_s26, 2  ;;  %s1557_s13 = scalar_lea.sflag [#allocation5], %s1556_s27 }
 0xaa1   : > { %p1891_p8 = pnand %p2857_p5, %p2856_p7 }
 0xaa3   : > { %2210 = dma.done.wait (!%p1891_p8), %s1557_s13, 128  }
 0xaa4   : > { %2212 = vsyncadd (!%p1891_p8), %s1557_s13, 4294967168  ;;  %s34_s26 = sadd.s32 1, %s2235_s26   ;;  %s2858_s21 = smov %s2219_s22 }
 0xaa5   : > { %p31_p1 = scmp.ge.s32.totalorder %s34_s26, 4   ;;  %s2859_s22 = smov %s2223_s23 }
 0xaa6   : > { %s2860_s23 = smov %s2519_s16  ;;  %s2861_s24 = smov %s2231_s25 }
 0xaa7   : > { %s2862_s25 = smov %s2864_s3  ;;  %33 = sbr.rel (!%p31_p1) target bundleno = 23 (0x17), region = 153 }
 0xaae   :  { %1562 = vsyncpa [#allocation4], 1 }
 0xaaf   :  { %1564 = vsyncpa [#allocation4 + $0x1], 1 }
 0xab0   :  { %1565 = vsyncpa [#allocation7], 1 }
 0xab1   :  { %1566 = vsyncpa [#allocation10], 1 }
 0xab2   :  { %1567 = vsyncpa [#allocation5], 1 }
 0xab3   :  { %1569 = vsyncpa [#allocation5 + $0x1], 1 }

</bundles_post_ra>
